<compile_context>
chip_gen: v6e
topology: v6e:2x2x1
jax: 0.10.0
libtpu: 0.0.40
codegen_flags: <defaults>
</compile_context>

<pallas_src>
import functools

import jax
import jax.numpy as jnp
from jax.experimental import pallas as pl
from jax.experimental.pallas import tpu as pltpu

BN_EPS = 1e-5
HID1 = 128      # first hidden width of the decoder backbone
HID2 = 512      # second hidden width of the decoder backbone

MEAN_MIN, MEAN_MAX = 1e-5, 1e6
DISP_MIN, DISP_MAX = 1e-4, 1e4


def _bn_relu(h, gamma, beta):
    """PyTorch BatchNorm1d (training mode, biased variance) + ReLU, one-pass stats."""
    n = h.shape[0]
    inv_n = 1.0 / n
    mean = jnp.sum(h, axis=0, keepdims=True) * inv_n
    var = jnp.sum(h * h, axis=0, keepdims=True) * inv_n - mean * mean
    var = jnp.maximum(var, 0.0)
    hn = (h - mean) * jax.lax.rsqrt(var + BN_EPS)
    return jnp.maximum(hn * gamma + beta, 0.0)


def _decoder_kernel(x_ref,
                    w1_ref, b1_ref, g1_ref, be1_ref,
                    w2_ref, b2_ref, g2_ref, be2_ref,
                    wm_ref, bm_ref, wd_ref, bd_ref,
                    mean_ref, disp_ref,
                    h_ref):
    j = pl.program_id(0)

    # The backbone depends only on the batch, not on the output tile:
    # compute it once (tile 0) and cache the bf16 activations in VMEM scratch.
    @pl.when(j == 0)
    def _():
        x = x_ref[...].astype(jnp.bfloat16)
        h1 = jnp.dot(x, w1_ref[...], preferred_element_type=jnp.float32) + b1_ref[...]
        h1 = _bn_relu(h1, g1_ref[...], be1_ref[...])
        h2 = jnp.dot(h1.astype(jnp.bfloat16), w2_ref[...],
                     preferred_element_type=jnp.float32) + b2_ref[...]
        h2 = _bn_relu(h2, g2_ref[...], be2_ref[...])
        h_ref[...] = h2.astype(jnp.bfloat16)

    h = h_ref[...]                                   # (B, 512) bf16

    # mean head: clamp(exp(h @ Wm + bm), 1e-5, 1e6)
    zm = jnp.dot(h, wm_ref[...], preferred_element_type=jnp.float32) + bm_ref[...]
    mean_ref[...] = jnp.clip(jnp.exp(zm), MEAN_MIN, MEAN_MAX)

    # disp head: clamp(softplus(h @ Wd + bd), 1e-4, 1e4)  (numerically stable softplus)
    zd = jnp.dot(h, wd_ref[...], preferred_element_type=jnp.float32) + bd_ref[...]
    sp = jnp.maximum(zd, 0.0) + jnp.log(1.0 + jnp.exp(-jnp.abs(zd)))
    disp_ref[...] = jnp.clip(sp, DISP_MIN, DISP_MAX)


def _round_up(x, m):
    return (x + m - 1) // m * m


@functools.partial(jax.jit, static_argnames=("tn",))
def decoder_forward(x, p, *, tn=512):
    """Decoder.forward: x:[B, entry_dim] -> (mean:[B, output_dim], disp:[B, output_dim])."""
    B, entry_dim = x.shape
    out_dim = p["wm"].shape[1]

    # Lane-dense output tile (multiple of 128); pad output_dim up to a tile multiple.
    tn = min(tn, _round_up(out_dim, 128))
    out_pad = _round_up(out_dim, tn)
    n_tiles = out_pad // tn

    def pad_n(a):
        return a if a.shape[1] == out_pad else jnp.pad(a, ((0, 0), (0, out_pad - a.shape[1])))

    wm, bm = pad_n(p["wm"]), pad_n(p["bm"])
    wd, bd = pad_n(p["wd"]), pad_n(p["bd"])

    full = lambda shape: pl.BlockSpec(shape, lambda j: (0, 0))
    tile = lambda rows: pl.BlockSpec((rows, tn), lambda j: (0, j))

    flops = 2 * B * (entry_dim * HID1 + HID1 * HID2 + 2 * HID2 * out_pad)
    transcendentals = 2 * B * out_pad + 2 * B * (HID1 + HID2) + (HID1 + HID2)
    bytes_accessed = (4 * x.size
                      + 2 * (p["w1"].size + p["w2"].size + wm.size + wd.size)   # bf16 weights
                      + 4 * (bm.size + bd.size + 6 * (HID1 + HID2))
                      + 2 * 4 * B * out_pad)                                    # f32 outputs

    mean, disp = pl.pallas_call(
        _decoder_kernel,
        out_shape=(jax.ShapeDtypeStruct((B, out_pad), jnp.float32),
                   jax.ShapeDtypeStruct((B, out_pad), jnp.float32)),
        grid_spec=pltpu.PrefetchScalarGridSpec(
            num_scalar_prefetch=0,
            grid=(n_tiles,),
            in_specs=[
                full((B, entry_dim)),
                full((entry_dim, HID1)), full((1, HID1)), full((1, HID1)), full((1, HID1)),
                full((HID1, HID2)), full((1, HID2)), full((1, HID2)), full((1, HID2)),
                tile(HID2), tile(1), tile(HID2), tile(1),
            ],
            out_specs=(tile(B), tile(B)),
            scratch_shapes=[pltpu.VMEM((B, HID2), jnp.bfloat16)],
        ),
        compiler_params=pltpu.CompilerParams(
            dimension_semantics=("arbitrary",),   # scratch carry across output tiles
            vmem_limit_bytes=64 * 1024 * 1024,
        ),
        cost_estimate=pl.CostEstimate(flops=flops,
                                      transcendentals=transcendentals,
                                      bytes_accessed=bytes_accessed),
    )(x,
      p["w1"], p["b1"], p["g1"], p["be1"],
      p["w2"], p["b2"], p["g2"], p["be2"],
      wm, bm, wd, bd)

    return mean[:, :out_dim], disp[:, :out_dim]


def init_decoder_params(key, entry_dim, output_dim):
    """nn.Linear default init (U(-1/sqrt(fan_in), +)), BatchNorm1d gamma=1/beta=0.
    Matmul weights stored as bf16 (HBM-traffic halving); biases / BN params f32."""
    def linear(k, fan_in, fan_out):
        bound = 1.0 / (fan_in ** 0.5)
        kw, kb = jax.random.split(k)
        w = jax.random.uniform(kw, (fan_in, fan_out), jnp.float32, -bound, bound)
        b = jax.random.uniform(kb, (1, fan_out), jnp.float32, -bound, bound)
        return w.astype(jnp.bfloat16), b

    k1, k2, k3, k4 = jax.random.split(key, 4)
    w1, b1 = linear(k1, entry_dim, HID1)
    w2, b2 = linear(k2, HID1, HID2)
    wm, bm = linear(k3, HID2, output_dim)
    wd, bd = linear(k4, HID2, output_dim)
    ones = lambda n: jnp.ones((1, n), jnp.float32)
    zeros = lambda n: jnp.zeros((1, n), jnp.float32)
    return dict(w1=w1, b1=b1, g1=ones(HID1), be1=zeros(HID1),
                w2=w2, b2=b2, g2=ones(HID2), be2=zeros(HID2),
                wm=wm, bm=bm, wd=wd, bd=bd)


def _reference_decoder(x, p):
    """Pure-JAX reference (same bf16-operand / f32-accumulate arithmetic)."""
    def bn_relu(h, g, b):
        n = h.shape[0]
        m = jnp.sum(h, axis=0, keepdims=True) / n
        v = jnp.maximum(jnp.sum(h * h, axis=0, keepdims=True) / n - m * m, 0.0)
        return jnp.maximum((h - m) * jax.lax.rsqrt(v + BN_EPS) * g + b, 0.0)

    h = bn_relu(jnp.dot(x.astype(jnp.bfloat16), p["w1"],
                        preferred_element_type=jnp.float32) + p["b1"], p["g1"], p["be1"])
    h = bn_relu(jnp.dot(h.astype(jnp.bfloat16), p["w2"],
                        preferred_element_type=jnp.float32) + p["b2"], p["g2"], p["be2"])
    hb = h.astype(jnp.bfloat16)
    zm = jnp.dot(hb, p["wm"], preferred_element_type=jnp.float32) + p["bm"]
    zd = jnp.dot(hb, p["wd"], preferred_element_type=jnp.float32) + p["bd"]
    mean = jnp.clip(jnp.exp(zm), MEAN_MIN, MEAN_MAX)
    disp = jnp.clip(jnp.maximum(zd, 0.0) + jnp.log(1.0 + jnp.exp(-jnp.abs(zd))),
                    DISP_MIN, DISP_MAX)
    return mean, disp


# TODO(synk): BatchNorm is evaluated with batch statistics (PyTorch training-mode
# default for a fresh module); eval-mode running-stat normalization would just swap
# the in-kernel stats for prefetched running_mean/var and is not implemented here.

if __name__ == "__main__":
    batch = 8
    entry_dim = 32
    output_dim = 300   # not a multiple of 128 -> exercises the lane-padding path

    key = jax.random.PRNGKey(0)
    kp, kx = jax.random.split(key)
    params = init_decoder_params(kp, entry_dim, output_dim)
    x = jax.random.normal(kx, (batch, entry_dim), jnp.float32)

    mean, disp = decoder_forward(x, params, tn=128)   # grid = (3,)
    mean = jax.block_until_ready(mean)
    disp = jax.block_until_ready(disp)

    ref_mean, ref_disp = _reference_decoder(x, params)
    assert mean.shape == (batch, output_dim) and disp.shape == (batch, output_dim)
    assert jnp.allclose(mean, ref_mean, rtol=5e-3, atol=5e-3), \
        float(jnp.max(jnp.abs(mean - ref_mean)))
    assert jnp.allclose(disp, ref_disp, rtol=5e-3, atol=5e-3), \
        float(jnp.max(jnp.abs(disp - ref_disp)))

    print("KERNEL_OK")
</pallas_src>

<mosaic_0001>
module attributes {stable_mosaic.version = 11 : i64} {
  func.func @_decoder_kernel(%arg0: i32, %arg1: memref<8x32xf32, #tpu.memory_space<vmem>>, %arg2: memref<32x128xbf16, #tpu.memory_space<vmem>>, %arg3: memref<1x128xf32, #tpu.memory_space<vmem>>, %arg4: memref<1x128xf32, #tpu.memory_space<vmem>>, %arg5: memref<1x128xf32, #tpu.memory_space<vmem>>, %arg6: memref<128x512xbf16, #tpu.memory_space<vmem>>, %arg7: memref<1x512xf32, #tpu.memory_space<vmem>>, %arg8: memref<1x512xf32, #tpu.memory_space<vmem>>, %arg9: memref<1x512xf32, #tpu.memory_space<vmem>>, %arg10: memref<512x128xbf16, #tpu.memory_space<vmem>>, %arg11: memref<1x128xf32, #tpu.memory_space<vmem>>, %arg12: memref<512x128xbf16, #tpu.memory_space<vmem>>, %arg13: memref<1x128xf32, #tpu.memory_space<vmem>>, %arg14: memref<8x128xf32, #tpu.memory_space<vmem>>, %arg15: memref<8x128xf32, #tpu.memory_space<vmem>>, %arg16: memref<8x512xbf16, #tpu.memory_space<vmem>>) attributes {dimension_semantics = [#tpu.dimension_semantics<arbitrary>], iteration_bounds = array<i64: 3>, scalar_prefetch = 0 : i64, scratch_operands = 1 : i64, tpu.core_type = #tpu.core_type<tc>, window_params = [{pipeline_mode = #tpu.pipeline_mode<synchronous>, transform_indices = @transform_0, window_bounds = array<i64: 8, 32>}, {pipeline_mode = #tpu.pipeline_mode<synchronous>, transform_indices = @transform_1, window_bounds = array<i64: 32, 128>}, {pipeline_mode = #tpu.pipeline_mode<synchronous>, transform_indices = @transform_2, window_bounds = array<i64: 1, 128>}, {pipeline_mode = #tpu.pipeline_mode<synchronous>, transform_indices = @transform_3, window_bounds = array<i64: 1, 128>}, {pipeline_mode = #tpu.pipeline_mode<synchronous>, transform_indices = @transform_4, window_bounds = array<i64: 1, 128>}, {pipeline_mode = #tpu.pipeline_mode<synchronous>, transform_indices = @transform_5, window_bounds = array<i64: 128, 512>}, {pipeline_mode = #tpu.pipeline_mode<synchronous>, transform_indices = @transform_6, window_bounds = array<i64: 1, 512>}, {pipeline_mode = #tpu.pipeline_mode<synchronous>, transform_indices = @transform_7, window_bounds = array<i64: 1, 512>}, {pipeline_mode = #tpu.pipeline_mode<synchronous>, transform_indices = @transform_8, window_bounds = array<i64: 1, 512>}, {transform_indices = @transform_9, window_bounds = array<i64: 512, 128>}, {transform_indices = @transform_10, window_bounds = array<i64: 1, 128>}, {transform_indices = @transform_11, window_bounds = array<i64: 512, 128>}, {transform_indices = @transform_12, window_bounds = array<i64: 1, 128>}, {transform_indices = @transform_13, window_bounds = array<i64: 8, 128>}, {transform_indices = @transform_14, window_bounds = array<i64: 8, 128>}]} {
    %c0_i32 = arith.constant 0 : i32
    %0 = arith.cmpi eq, %arg0, %c0_i32 : i32
    %1 = arith.extui %0 : i1 to i32
    %c0_i32_0 = arith.constant 0 : i32
    %2 = arith.cmpi ne, %1, %c0_i32_0 : i32
    scf.if %2 {
      %c0_22 = arith.constant 0 : index
      %c0_23 = arith.constant 0 : index
      %35 = vector.load %arg1[%c0_22, %c0_23] : memref<8x32xf32, #tpu.memory_space<vmem>>, vector<8x32xf32>
      %36 = arith.truncf %35 : vector<8x32xf32> to vector<8x32xbf16>
      %c0_24 = arith.constant 0 : index
      %c0_25 = arith.constant 0 : index
      %37 = vector.load %arg2[%c0_24, %c0_25] : memref<32x128xbf16, #tpu.memory_space<vmem>>, vector<32x128xbf16>
      %cst_26 = arith.constant dense<0.000000e+00> : vector<8x128xf32>
      %38 = tpu.matmul %36, %37, %cst_26 {dimension_numbers = #tpu.dot_dimension_numbers<[1], [0], [0], [1], [0, 0, 1, 1], [], []>} : vector<8x32xbf16>, vector<32x128xbf16>, vector<8x128xf32> -> vector<8x128xf32>
      %c0_27 = arith.constant 0 : index
      %c0_28 = arith.constant 0 : index
      %39 = vector.load %arg3[%c0_27, %c0_28] : memref<1x128xf32, #tpu.memory_space<vmem>>, vector<1x128xf32>
      %40 = vector.broadcast %39 : vector<1x128xf32> to vector<8x128xf32>
      %41 = arith.addf %38, %40 : vector<8x128xf32>
      %c0_29 = arith.constant 0 : index
      %c0_30 = arith.constant 0 : index
      %42 = vector.load %arg4[%c0_29, %c0_30] : memref<1x128xf32, #tpu.memory_space<vmem>>, vector<1x128xf32>
      %c0_31 = arith.constant 0 : index
      %c0_32 = arith.constant 0 : index
      %43 = vector.load %arg5[%c0_31, %c0_32] : memref<1x128xf32, #tpu.memory_space<vmem>>, vector<1x128xf32>
      %cst_33 = arith.constant dense<0.000000e+00> : vector<128xf32>
      %44 = vector.multi_reduction <add>, %41, %cst_33 [0] : vector<8x128xf32> to vector<128xf32>
      %45 = vector.shape_cast %44 : vector<128xf32> to vector<1x128xf32>
      %cst_34 = arith.constant 1.250000e-01 : f32
      %46 = vector.broadcast %cst_34 : f32 to vector<1x128xf32>
      %47 = arith.mulf %45, %46 : vector<1x128xf32>
      %48 = arith.mulf %41, %41 : vector<8x128xf32>
      %cst_35 = arith.constant dense<0.000000e+00> : vector<128xf32>
      %49 = vector.multi_reduction <add>, %48, %cst_35 [0] : vector<8x128xf32> to vector<128xf32>
      %50 = vector.shape_cast %49 : vector<128xf32> to vector<1x128xf32>
      %cst_36 = arith.constant 1.250000e-01 : f32
      %51 = vector.broadcast %cst_36 : f32 to vector<1x128xf32>
      %52 = arith.mulf %50, %51 : vector<1x128xf32>
      %53 = arith.mulf %47, %47 : vector<1x128xf32>
      %54 = arith.subf %52, %53 : vector<1x128xf32>
      %cst_37 = arith.constant 0.000000e+00 : f32
      %55 = vector.broadcast %cst_37 : f32 to vector<1x128xf32>
      %56 = arith.maximumf %54, %55 : vector<1x128xf32>
      %57 = vector.broadcast %47 : vector<1x128xf32> to vector<8x128xf32>
      %58 = arith.subf %41, %57 : vector<8x128xf32>
      %cst_38 = arith.constant 9.99999974E-6 : f32
      %59 = vector.broadcast %cst_38 : f32 to vector<1x128xf32>
      %60 = arith.addf %56, %59 : vector<1x128xf32>
      %61 = math.rsqrt %60 : vector<1x128xf32>
      %62 = vector.broadcast %61 : vector<1x128xf32> to vector<8x128xf32>
      %63 = arith.mulf %58, %62 : vector<8x128xf32>
      %64 = vector.broadcast %42 : vector<1x128xf32> to vector<8x128xf32>
      %65 = arith.mulf %63, %64 : vector<8x128xf32>
      %66 = vector.broadcast %43 : vector<1x128xf32> to vector<8x128xf32>
      %67 = arith.addf %65, %66 : vector<8x128xf32>
      %cst_39 = arith.constant 0.000000e+00 : f32
      %68 = vector.broadcast %cst_39 : f32 to vector<8x128xf32>
      %69 = arith.maximumf %67, %68 : vector<8x128xf32>
      %70 = arith.truncf %69 : vector<8x128xf32> to vector<8x128xbf16>
      %c0_40 = arith.constant 0 : index
      %c0_41 = arith.constant 0 : index
      %71 = vector.load %arg6[%c0_40, %c0_41] : memref<128x512xbf16, #tpu.memory_space<vmem>>, vector<128x512xbf16>
      %cst_42 = arith.constant dense<0.000000e+00> : vector<8x512xf32>
      %72 = tpu.matmul %70, %71, %cst_42 {dimension_numbers = #tpu.dot_dimension_numbers<[1], [0], [0], [1], [0, 0, 1, 1], [], []>} : vector<8x128xbf16>, vector<128x512xbf16>, vector<8x512xf32> -> vector<8x512xf32>
      %c0_43 = arith.constant 0 : index
      %c0_44 = arith.constant 0 : index
      %73 = vector.load %arg7[%c0_43, %c0_44] : memref<1x512xf32, #tpu.memory_space<vmem>>, vector<1x512xf32>
      %74 = vector.broadcast %73 : vector<1x512xf32> to vector<8x512xf32>
      %75 = arith.addf %72, %74 : vector<8x512xf32>
      %c0_45 = arith.constant 0 : index
      %c0_46 = arith.constant 0 : index
      %76 = vector.load %arg8[%c0_45, %c0_46] : memref<1x512xf32, #tpu.memory_space<vmem>>, vector<1x512xf32>
      %c0_47 = arith.constant 0 : index
      %c0_48 = arith.constant 0 : index
      %77 = vector.load %arg9[%c0_47, %c0_48] : memref<1x512xf32, #tpu.memory_space<vmem>>, vector<1x512xf32>
      %cst_49 = arith.constant dense<0.000000e+00> : vector<512xf32>
      %78 = vector.multi_reduction <add>, %75, %cst_49 [0] : vector<8x512xf32> to vector<512xf32>
      %79 = vector.shape_cast %78 : vector<512xf32> to vector<1x512xf32>
      %cst_50 = arith.constant 1.250000e-01 : f32
      %80 = vector.broadcast %cst_50 : f32 to vector<1x512xf32>
      %81 = arith.mulf %79, %80 : vector<1x512xf32>
      %82 = arith.mulf %75, %75 : vector<8x512xf32>
      %cst_51 = arith.constant dense<0.000000e+00> : vector<512xf32>
      %83 = vector.multi_reduction <add>, %82, %cst_51 [0] : vector<8x512xf32> to vector<512xf32>
      %84 = vector.shape_cast %83 : vector<512xf32> to vector<1x512xf32>
      %cst_52 = arith.constant 1.250000e-01 : f32
      %85 = vector.broadcast %cst_52 : f32 to vector<1x512xf32>
      %86 = arith.mulf %84, %85 : vector<1x512xf32>
      %87 = arith.mulf %81, %81 : vector<1x512xf32>
      %88 = arith.subf %86, %87 : vector<1x512xf32>
      %cst_53 = arith.constant 0.000000e+00 : f32
      %89 = vector.broadcast %cst_53 : f32 to vector<1x512xf32>
      %90 = arith.maximumf %88, %89 : vector<1x512xf32>
      %91 = vector.broadcast %81 : vector<1x512xf32> to vector<8x512xf32>
      %92 = arith.subf %75, %91 : vector<8x512xf32>
      %cst_54 = arith.constant 9.99999974E-6 : f32
      %93 = vector.broadcast %cst_54 : f32 to vector<1x512xf32>
      %94 = arith.addf %90, %93 : vector<1x512xf32>
      %95 = math.rsqrt %94 : vector<1x512xf32>
      %96 = vector.broadcast %95 : vector<1x512xf32> to vector<8x512xf32>
      %97 = arith.mulf %92, %96 : vector<8x512xf32>
      %98 = vector.broadcast %76 : vector<1x512xf32> to vector<8x512xf32>
      %99 = arith.mulf %97, %98 : vector<8x512xf32>
      %100 = vector.broadcast %77 : vector<1x512xf32> to vector<8x512xf32>
      %101 = arith.addf %99, %100 : vector<8x512xf32>
      %cst_55 = arith.constant 0.000000e+00 : f32
      %102 = vector.broadcast %cst_55 : f32 to vector<8x512xf32>
      %103 = arith.maximumf %101, %102 : vector<8x512xf32>
      %104 = arith.truncf %103 : vector<8x512xf32> to vector<8x512xbf16>
      %c0_56 = arith.constant 0 : index
      %c0_57 = arith.constant 0 : index
      %105 = vector.load %arg16[%c0_56, %c0_57] : memref<8x512xbf16, #tpu.memory_space<vmem>>, vector<8x512xbf16>
      tpu.vector_store %arg16[%c0_56, %c0_57], %104 {strides = array<i32>} : memref<8x512xbf16, #tpu.memory_space<vmem>>, vector<8x512xbf16>,
    } else {
    }
    %c0 = arith.constant 0 : index
    %c0_1 = arith.constant 0 : index
    %3 = vector.load %arg16[%c0, %c0_1] : memref<8x512xbf16, #tpu.memory_space<vmem>>, vector<8x512xbf16>
    %c0_2 = arith.constant 0 : index
    %c0_3 = arith.constant 0 : index
    %4 = vector.load %arg10[%c0_2, %c0_3] : memref<512x128xbf16, #tpu.memory_space<vmem>>, vector<512x128xbf16>
    %cst = arith.constant dense<0.000000e+00> : vector<8x128xf32>
    %5 = tpu.matmul %3, %4, %cst {dimension_numbers = #tpu.dot_dimension_numbers<[1], [0], [0], [1], [0, 0, 1, 1], [], []>} : vector<8x512xbf16>, vector<512x128xbf16>, vector<8x128xf32> -> vector<8x128xf32>
    %c0_4 = arith.constant 0 : index
    %c0_5 = arith.constant 0 : index
    %6 = vector.load %arg11[%c0_4, %c0_5] : memref<1x128xf32, #tpu.memory_space<vmem>>, vector<1x128xf32>
    %7 = vector.broadcast %6 : vector<1x128xf32> to vector<8x128xf32>
    %8 = arith.addf %5, %7 : vector<8x128xf32>
    %9 = math.exp %8 : vector<8x128xf32>
    %cst_6 = arith.constant 9.99999974E-6 : f32
    %cst_7 = arith.constant 1.000000e+06 : f32
    %10 = vector.broadcast %cst_6 : f32 to vector<8x128xf32>
    %11 = arith.maximumf %10, %9 : vector<8x128xf32>
    %12 = vector.broadcast %cst_7 : f32 to vector<8x128xf32>
    %13 = arith.minimumf %12, %11 : vector<8x128xf32>
    %c0_8 = arith.constant 0 : index
    %c0_9 = arith.constant 0 : index
    %14 = vector.load %arg14[%c0_8, %c0_9] : memref<8x128xf32, #tpu.memory_space<vmem>>, vector<8x128xf32>
    tpu.vector_store %arg14[%c0_8, %c0_9], %13 {strides = array<i32>} : memref<8x128xf32, #tpu.memory_space<vmem>>, vector<8x128xf32>,
    %c0_10 = arith.constant 0 : index
    %c0_11 = arith.constant 0 : index
    %15 = vector.load %arg12[%c0_10, %c0_11] : memref<512x128xbf16, #tpu.memory_space<vmem>>, vector<512x128xbf16>
    %cst_12 = arith.constant dense<0.000000e+00> : vector<8x128xf32>
    %16 = tpu.matmul %3, %15, %cst_12 {dimension_numbers = #tpu.dot_dimension_numbers<[1], [0], [0], [1], [0, 0, 1, 1], [], []>} : vector<8x512xbf16>, vector<512x128xbf16>, vector<8x128xf32> -> vector<8x128xf32>
    %c0_13 = arith.constant 0 : index
    %c0_14 = arith.constant 0 : index
    %17 = vector.load %arg13[%c0_13, %c0_14] : memref<1x128xf32, #tpu.memory_space<vmem>>, vector<1x128xf32>
    %18 = vector.broadcast %17 : vector<1x128xf32> to vector<8x128xf32>
    %19 = arith.addf %16, %18 : vector<8x128xf32>
    %cst_15 = arith.constant 0.000000e+00 : f32
    %20 = vector.broadcast %cst_15 : f32 to vector<8x128xf32>
    %21 = arith.maximumf %19, %20 : vector<8x128xf32>
    %22 = math.absf %19 : vector<8x128xf32>
    %cst_16 = arith.constant 0.000000e+00 : f32
    %23 = vector.broadcast %cst_16 : f32 to vector<8x128xf32>
    %24 = arith.subf %23, %22 : vector<8x128xf32>
    %25 = math.exp %24 : vector<8x128xf32>
    %cst_17 = arith.constant 1.000000e+00 : f32
    %26 = vector.broadcast %cst_17 : f32 to vector<8x128xf32>
    %27 = arith.addf %26, %25 : vector<8x128xf32>
    %28 = math.log %27 : vector<8x128xf32>
    %29 = arith.addf %21, %28 : vector<8x128xf32>
    %cst_18 = arith.constant 9.99999974E-5 : f32
    %cst_19 = arith.constant 1.000000e+04 : f32
    %30 = vector.broadcast %cst_18 : f32 to vector<8x128xf32>
    %31 = arith.maximumf %30, %29 : vector<8x128xf32>
    %32 = vector.broadcast %cst_19 : f32 to vector<8x128xf32>
    %33 = arith.minimumf %32, %31 : vector<8x128xf32>
    %c0_20 = arith.constant 0 : index
    %c0_21 = arith.constant 0 : index
    %34 = vector.load %arg15[%c0_20, %c0_21] : memref<8x128xf32, #tpu.memory_space<vmem>>, vector<8x128xf32>
    tpu.vector_store %arg15[%c0_20, %c0_21], %33 {strides = array<i32>} : memref<8x128xf32, #tpu.memory_space<vmem>>, vector<8x128xf32>,
    return
  }
  func.func @transform_0(%arg0: i32) -> (i32, i32) {
    %c0_i32 = arith.constant 0 : i32
    %c0_i32_0 = arith.constant 0 : i32
    %c0_i32_1 = arith.constant 0 : i32
    return %c0_i32, %c0_i32_0 : i32, i32
  }
  func.func @transform_1(%arg0: i32) -> (i32, i32) {
    %c0_i32 = arith.constant 0 : i32
    %c0_i32_0 = arith.constant 0 : i32
    %c0_i32_1 = arith.constant 0 : i32
    return %c0_i32, %c0_i32_0 : i32, i32
  }
  func.func @transform_2(%arg0: i32) -> (i32, i32) {
    %c0_i32 = arith.constant 0 : i32
    %c0_i32_0 = arith.constant 0 : i32
    %c0_i32_1 = arith.constant 0 : i32
    return %c0_i32, %c0_i32_0 : i32, i32
  }
  func.func @transform_3(%arg0: i32) -> (i32, i32) {
    %c0_i32 = arith.constant 0 : i32
    %c0_i32_0 = arith.constant 0 : i32
    %c0_i32_1 = arith.constant 0 : i32
    return %c0_i32, %c0_i32_0 : i32, i32
  }
  func.func @transform_4(%arg0: i32) -> (i32, i32) {
    %c0_i32 = arith.constant 0 : i32
    %c0_i32_0 = arith.constant 0 : i32
    %c0_i32_1 = arith.constant 0 : i32
    return %c0_i32, %c0_i32_0 : i32, i32
  }
  func.func @transform_5(%arg0: i32) -> (i32, i32) {
    %c0_i32 = arith.constant 0 : i32
    %c0_i32_0 = arith.constant 0 : i32
    %c0_i32_1 = arith.constant 0 : i32
    return %c0_i32, %c0_i32_0 : i32, i32
  }
  func.func @transform_6(%arg0: i32) -> (i32, i32) {
    %c0_i32 = arith.constant 0 : i32
    %c0_i32_0 = arith.constant 0 : i32
    %c0_i32_1 = arith.constant 0 : i32
    return %c0_i32, %c0_i32_0 : i32, i32
  }
  func.func @transform_7(%arg0: i32) -> (i32, i32) {
    %c0_i32 = arith.constant 0 : i32
    %c0_i32_0 = arith.constant 0 : i32
    %c0_i32_1 = arith.constant 0 : i32
    return %c0_i32, %c0_i32_0 : i32, i32
  }
  func.func @transform_8(%arg0: i32) -> (i32, i32) {
    %c0_i32 = arith.constant 0 : i32
    %c0_i32_0 = arith.constant 0 : i32
    %c0_i32_1 = arith.constant 0 : i32
    return %c0_i32, %c0_i32_0 : i32, i32
  }
  func.func @transform_9(%arg0: i32) -> (i32, i32) {
    %c0_i32 = arith.constant 0 : i32
    %c0_i32_0 = arith.constant 0 : i32
    return %c0_i32, %arg0 : i32, i32
  }
  func.func @transform_10(%arg0: i32) -> (i32, i32) {
    %c0_i32 = arith.constant 0 : i32
    %c0_i32_0 = arith.constant 0 : i32
    return %c0_i32, %arg0 : i32, i32
  }
  func.func @transform_11(%arg0: i32) -> (i32, i32) {
    %c0_i32 = arith.constant 0 : i32
    %c0_i32_0 = arith.constant 0 : i32
    return %c0_i32, %arg0 : i32, i32
  }
  func.func @transform_12(%arg0: i32) -> (i32, i32) {
    %c0_i32 = arith.constant 0 : i32
    %c0_i32_0 = arith.constant 0 : i32
    return %c0_i32, %arg0 : i32, i32
  }
  func.func @transform_13(%arg0: i32) -> (i32, i32) {
    %c0_i32 = arith.constant 0 : i32
    %c0_i32_0 = arith.constant 0 : i32
    return %c0_i32, %arg0 : i32, i32
  }
  func.func @transform_14(%arg0: i32) -> (i32, i32) {
    %c0_i32 = arith.constant 0 : i32
    %c0_i32_0 = arith.constant 0 : i32
    return %c0_i32, %arg0 : i32, i32
  }
}

</mosaic_0001>

<bundles_post_ra>
// kernel: decoder_forward.1
= control target key start
LH: loop header
LB: loop body
LE: loop exit
PB: predicated region body
PF: predicated region fallthrough
CT: control target
= control target key end

     0   :  { %s3823_s0 = inlined_call_operand.vmem [shape: f32[8,32], index: 0, kind: input, shape index: {}]   ;;  %s3824_s1 = inlined_call_operand.vmem [shape: bf16[32,128], index: 1, kind: input, shape index: {}]   ;;  %s3825_s2 = inlined_call_operand.vmem [shape: f32[1,128], index: 2, kind: input, shape index: {}]   ;;  %s3826_s3 = inlined_call_operand.vmem [shape: f32[1,128], index: 3, kind: input, shape index: {}]   ;;  %s3827_s4 = inlined_call_operand.vmem [shape: f32[1,128], index: 4, kind: input, shape index: {}]   ;;  %s3828_s5 = inlined_call_operand.vmem [shape: bf16[128,512], index: 5, kind: input, shape index: {}]   ;;  %s3829_s6 = inlined_call_operand.vmem [shape: f32[1,512], index: 6, kind: input, shape index: {}]   ;;  %s3830_s7 = inlined_call_operand.vmem [shape: f32[1,512], index: 7, kind: input, shape index: {}]   ;;  %s3831_s8 = inlined_call_operand.vmem [shape: f32[1,512], index: 8, kind: input, shape index: {}]   ;;  %s3832_s9 = inlined_call_operand.vmem [shape: bf16[512,384], index: 9, kind: input, shape index: {}]   ;;  %s3833_s10 = inlined_call_operand.vmem [shape: f32[1,384], index: 10, kind: input, shape index: {}]   ;;  %s3834_s11 = inlined_call_operand.vmem [shape: bf16[512,384], index: 11, kind: input, shape index: {}]   ;;  %s3835_s12 = inlined_call_operand.vmem [shape: f32[1,384], index: 12, kind: input, shape index: {}]   ;;  %s3836_s13 = inlined_call_operand.hbm [shape: f32[8,384], index: 13, kind: output, shape index: {0}]   ;;  %s3837_s14 = inlined_call_operand.hbm [shape: f32[8,384], index: 14, kind: output, shape index: {1}]  }
   0x1   :  { %3846 = sst [smem:[#allocation18_spill]] %s3832_s9 }
   0x2   :  { %3847 = sst [smem:[#allocation19_spill]] %s3834_s11 }
   0x3   :  { %20 = vsyncpa [#allocation6], 0 }
   0x4   :  { %22 = vsyncpa [#allocation6 + $0x1], 0 }
   0x5   :  { %23 = vsyncpa [#allocation8], 0 }
   0x6   :  { %25 = vsyncpa [#allocation8 + $0x1], 0  ;;  %s3154_s29 = smov 0   ;;  %s3156_s30 = smov 0  }
   0x7   :  { %s3158_s15 = smov 0   ;;  %s3160_s16 = smov 0  }
   0x8 LB: > { %3848 = sst [smem:[#allocation11_spill]] %s3060_s29  ;;  %s3175_s17 = sadd.s32 4294967295, %s3072_s16   ;;  %s3072_s16 = sphi %s3160_s16, %s3866_s16   ;;  %s3068_s15 = sphi %s3158_s15, %s3869_s15   ;;  %s3064_s30 = sphi %s3156_s30, %s3868_s30   ;;  %s3060_s29 = sphi %s3154_s29, %s3867_s29  }
   0x9   : > { %3849 = sst [smem:[#allocation12_spill]] %s3064_s30  ;;  %s2571_s18 = sadd.s32 4294967294, %s3072_s16  }
   0xa   : > { %3850 = sst [smem:[#allocation13_spill]] %s3068_s15  ;;  %s3179_s19 = sadd.s32 1, %s3072_s16  }
   0xb   : > { %3851 = sst [smem:[#allocation14_spill]] %s3072_s16  ;;  %s227_s20 = sadd.s32 1, %s3068_s15 }
   0xc   : > { %3852 = sst [smem:[#allocation15_spill]] %s3179_s19  ;;  %s224_s21 = ssub.s32 %s3072_s16, %s3179_s19 }
   0xd   : > { %p234_p0 = scmp.ne.s32.totalorder %s3068_s15, %s3064_s30  ;;  %p225_p1 = scmp.eq.s32.totalorder %s224_s21, 0 }
   0xe   : > { %p235_p2 = scmp.eq.s32.totalorder %s3072_s16, 0  ;;  %p342_p3 = scmp.eq.s32.totalorder %s3175_s17, 2 }
   0xf   : > { %p347_p4 = scmp.ne.s32.totalorder %s3064_s30, %s3060_s29  ;;  %p348_p7 = scmp.eq.s32.totalorder %s2571_s18, 2 }
  0x10   : > { %s3191_s22 = scalar_select %p225_p1, %s3068_s15, %s227_s20  }
  0x11   : > { %p3193_p5 = por %p235_p2, %p234_p0  ;;  %p3197_p6 = por %p342_p3, %p234_p0 }
  0x12   : > { %3853 = sst [smem:[#allocation16_spill]] %s3191_s22  ;;  %p3201_p8 = por %p348_p7, %p347_p4 }
  0x13   : > { %p2573_p9 = scmp.ge.s32.totalorder %s3072_s16, 3 }
  0x14   : > { %s3856_s25 = scalar_select %p3201_p8, 1, 0 }
  0x15   : > { %417 = sbr.rel (%p2573_p9) target bundleno = 130 (0x82), region = 52 }
  0x16   : > { %3857 = sst [smem:[#allocation17_spill]] %s3856_s25 }
  0x1a   : > { %420 = sbr.rel (!%p3193_p5) target bundleno = 78 (0x4e), region = 56  ;;  %s422_s26 = sand.u32 (%p3193_p5), 1, %s3068_s15  }
  0x1b   : > { %s2575_s27 = sshll.u32 (%p3193_p5), %s3072_s16, 2  ;;  %s2574_s28 = sshll.u32 (%p3193_p5), %s422_s26, 8 }
  0x1c   : > { %s3858_s9 = sld [smem:[#allocation18_spill]] (%p3193_p5)  ;;  %s3217_s18 = scalar_lea.vmem (%p3193_p5), [#allocation3], %s2574_s28 }
  0x22   : > { %s3213_s22 = scalar_lea.vmem %s3858_s9, %s2575_s27 }
  0x23   : > { %v443_v0 = vld [vmem:[%s3213_s22] sm:$0xf]  ;;  %v445_v1 = vld [vmem:[%s3213_s22 + $0xc] sm:$0xf]  ;;  %v447_v2 = vld [vmem:[%s3213_s22 + $0x18] sm:$0xf] }
  0x24   : > { %444 = vst [vmem:[%s3217_s18] sm:$0xf] %v443_v0  ;;  %446 = vst [vmem:[%s3217_s18 + $0x4] sm:$0xf] %v445_v1  ;;  %v449_v3 = vld [vmem:[%s3213_s22 + $0x24] sm:$0xf] }
  0x25   : > { %v451_v4 = vld [vmem:[%s3213_s22 + $0x30] sm:$0xf]  ;;  %448 = vst [vmem:[%s3217_s18 + $0x8] sm:$0xf] %v447_v2  ;;  %450 = vst [vmem:[%s3217_s18 + $0xc] sm:$0xf] %v449_v3 }
  0x26   : > { %452 = vst [vmem:[%s3217_s18 + $0x10] sm:$0xf] %v451_v4  ;;  %v453_v5 = vld [vmem:[%s3213_s22 + $0x3c] sm:$0xf]  ;;  %v455_v6 = vld [vmem:[%s3213_s22 + $0x48] sm:$0xf] }
  0x27   : > { %v457_v7 = vld [vmem:[%s3213_s22 + $0x54] sm:$0xf]  ;;  %454 = vst [vmem:[%s3217_s18 + $0x14] sm:$0xf] %v453_v5  ;;  %456 = vst [vmem:[%s3217_s18 + $0x18] sm:$0xf] %v455_v6 }
  0x28   : > { %458 = vst [vmem:[%s3217_s18 + $0x1c] sm:$0xf] %v457_v7  ;;  %v459_v8 = vld [vmem:[%s3213_s22 + $0x60] sm:$0xf]  ;;  %v461_v9 = vld [vmem:[%s3213_s22 + $0x6c] sm:$0xf] }
  0x29   : > { %v463_v10 = vld [vmem:[%s3213_s22 + $0x78] sm:$0xf]  ;;  %460 = vst [vmem:[%s3217_s18 + $0x20] sm:$0xf] %v459_v8  ;;  %462 = vst [vmem:[%s3217_s18 + $0x24] sm:$0xf] %v461_v9 }
  0x2a   : > { %464 = vst [vmem:[%s3217_s18 + $0x28] sm:$0xf] %v463_v10  ;;  %v465_v11 = vld [vmem:[%s3213_s22 + $0x84] sm:$0xf]  ;;  %v467_v12 = vld [vmem:[%s3213_s22 + $0x90] sm:$0xf] }
  0x2b   : > { %v469_v13 = vld [vmem:[%s3213_s22 + $0x9c] sm:$0xf]  ;;  %466 = vst [vmem:[%s3217_s18 + $0x2c] sm:$0xf] %v465_v11  ;;  %468 = vst [vmem:[%s3217_s18 + $0x30] sm:$0xf] %v467_v12 }
  0x2c   : > { %470 = vst [vmem:[%s3217_s18 + $0x34] sm:$0xf] %v469_v13  ;;  %v471_v14 = vld [vmem:[%s3213_s22 + $0xa8] sm:$0xf]  ;;  %v473_v15 = vld [vmem:[%s3213_s22 + $0xb4] sm:$0xf] }
  0x2d   : > { %v475_v16 = vld [vmem:[%s3213_s22 + $0xc0] sm:$0xf]  ;;  %472 = vst [vmem:[%s3217_s18 + $0x38] sm:$0xf] %v471_v14  ;;  %474 = vst [vmem:[%s3217_s18 + $0x3c] sm:$0xf] %v473_v15 }
  0x2e   : > { %476 = vst [vmem:[%s3217_s18 + $0x40] sm:$0xf] %v475_v16  ;;  %v477_v17 = vld [vmem:[%s3213_s22 + $0xcc] sm:$0xf]  ;;  %v479_v18 = vld [vmem:[%s3213_s22 + $0xd8] sm:$0xf] }
  0x2f   : > { %v481_v19 = vld [vmem:[%s3213_s22 + $0xe4] sm:$0xf]  ;;  %478 = vst [vmem:[%s3217_s18 + $0x44] sm:$0xf] %v477_v17  ;;  %480 = vst [vmem:[%s3217_s18 + $0x48] sm:$0xf] %v479_v18 }
  0x30   : > { %482 = vst [vmem:[%s3217_s18 + $0x4c] sm:$0xf] %v481_v19  ;;  %v483_v20 = vld [vmem:[%s3213_s22 + $0xf0] sm:$0xf]  ;;  %v485_v21 = vld [vmem:[%s3213_s22 + $0xfc] sm:$0xf] }
  0x31   : > { %v487_v22 = vld [vmem:[%s3213_s22 + $0x108] sm:$0xf]  ;;  %484 = vst [vmem:[%s3217_s18 + $0x50] sm:$0xf] %v483_v20  ;;  %486 = vst [vmem:[%s3217_s18 + $0x54] sm:$0xf] %v485_v21 }
  0x32   : > { %488 = vst [vmem:[%s3217_s18 + $0x58] sm:$0xf] %v487_v22  ;;  %v489_v23 = vld [vmem:[%s3213_s22 + $0x114] sm:$0xf]  ;;  %v491_v24 = vld [vmem:[%s3213_s22 + $0x120] sm:$0xf] }
  0x33   : > { %v493_v25 = vld [vmem:[%s3213_s22 + $0x12c] sm:$0xf]  ;;  %490 = vst [vmem:[%s3217_s18 + $0x5c] sm:$0xf] %v489_v23  ;;  %492 = vst [vmem:[%s3217_s18 + $0x60] sm:$0xf] %v491_v24 }
  0x34   : > { %494 = vst [vmem:[%s3217_s18 + $0x64] sm:$0xf] %v493_v25  ;;  %v495_v26 = vld [vmem:[%s3213_s22 + $0x138] sm:$0xf]  ;;  %v497_v27 = vld [vmem:[%s3213_s22 + $0x144] sm:$0xf] }
  0x35   : > { %v499_v28 = vld [vmem:[%s3213_s22 + $0x150] sm:$0xf]  ;;  %496 = vst [vmem:[%s3217_s18 + $0x68] sm:$0xf] %v495_v26  ;;  %498 = vst [vmem:[%s3217_s18 + $0x6c] sm:$0xf] %v497_v27 }
  0x36   : > { %500 = vst [vmem:[%s3217_s18 + $0x70] sm:$0xf] %v499_v28  ;;  %v501_v29 = vld [vmem:[%s3213_s22 + $0x15c] sm:$0xf]  ;;  %v503_v30 = vld [vmem:[%s3213_s22 + $0x168] sm:$0xf] }
  0x37   : > { %v505_v31 = vld [vmem:[%s3213_s22 + $0x174] sm:$0xf]  ;;  %502 = vst [vmem:[%s3217_s18 + $0x74] sm:$0xf] %v501_v29  ;;  %504 = vst [vmem:[%s3217_s18 + $0x78] sm:$0xf] %v503_v30 }
  0x38   : > { %506 = vst [vmem:[%s3217_s18 + $0x7c] sm:$0xf] %v505_v31  ;;  %v507_v32 = vld [vmem:[%s3213_s22 + $0x180] sm:$0xf]  ;;  %v509_v33 = vld [vmem:[%s3213_s22 + $0x18c] sm:$0xf] }
  0x39   : > { %v511_v34 = vld [vmem:[%s3213_s22 + $0x198] sm:$0xf]  ;;  %508 = vst [vmem:[%s3217_s18 + $0x80] sm:$0xf] %v507_v32  ;;  %510 = vst [vmem:[%s3217_s18 + $0x84] sm:$0xf] %v509_v33 }
  0x3a   : > { %512 = vst [vmem:[%s3217_s18 + $0x88] sm:$0xf] %v511_v34  ;;  %v513_v35 = vld [vmem:[%s3213_s22 + $0x1a4] sm:$0xf]  ;;  %v515_v36 = vld [vmem:[%s3213_s22 + $0x1b0] sm:$0xf] }
  0x3b   : > { %v517_v37 = vld [vmem:[%s3213_s22 + $0x1bc] sm:$0xf]  ;;  %514 = vst [vmem:[%s3217_s18 + $0x8c] sm:$0xf] %v513_v35  ;;  %516 = vst [vmem:[%s3217_s18 + $0x90] sm:$0xf] %v515_v36 }
  0x3c   : > { %518 = vst [vmem:[%s3217_s18 + $0x94] sm:$0xf] %v517_v37  ;;  %v519_v38 = vld [vmem:[%s3213_s22 + $0x1c8] sm:$0xf]  ;;  %v521_v39 = vld [vmem:[%s3213_s22 + $0x1d4] sm:$0xf] }
  0x3d   : > { %v523_v40 = vld [vmem:[%s3213_s22 + $0x1e0] sm:$0xf]  ;;  %520 = vst [vmem:[%s3217_s18 + $0x98] sm:$0xf] %v519_v38  ;;  %522 = vst [vmem:[%s3217_s18 + $0x9c] sm:$0xf] %v521_v39 }
  0x3e   : > { %524 = vst [vmem:[%s3217_s18 + $0xa0] sm:$0xf] %v523_v40  ;;  %v525_v41 = vld [vmem:[%s3213_s22 + $0x1ec] sm:$0xf]  ;;  %v527_v42 = vld [vmem:[%s3213_s22 + $0x1f8] sm:$0xf] }
  0x3f   : > { %v529_v43 = vld [vmem:[%s3213_s22 + $0x204] sm:$0xf]  ;;  %526 = vst [vmem:[%s3217_s18 + $0xa4] sm:$0xf] %v525_v41  ;;  %528 = vst [vmem:[%s3217_s18 + $0xa8] sm:$0xf] %v527_v42 }
  0x40   : > { %530 = vst [vmem:[%s3217_s18 + $0xac] sm:$0xf] %v529_v43  ;;  %v531_v44 = vld [vmem:[%s3213_s22 + $0x210] sm:$0xf]  ;;  %v533_v45 = vld [vmem:[%s3213_s22 + $0x21c] sm:$0xf] }
  0x41   : > { %v535_v46 = vld [vmem:[%s3213_s22 + $0x228] sm:$0xf]  ;;  %532 = vst [vmem:[%s3217_s18 + $0xb0] sm:$0xf] %v531_v44  ;;  %534 = vst [vmem:[%s3217_s18 + $0xb4] sm:$0xf] %v533_v45 }
  0x42   : > { %536 = vst [vmem:[%s3217_s18 + $0xb8] sm:$0xf] %v535_v46  ;;  %v537_v47 = vld [vmem:[%s3213_s22 + $0x234] sm:$0xf]  ;;  %v539_v48 = vld [vmem:[%s3213_s22 + $0x240] sm:$0xf] }
  0x43   : > { %v541_v49 = vld [vmem:[%s3213_s22 + $0x24c] sm:$0xf]  ;;  %538 = vst [vmem:[%s3217_s18 + $0xbc] sm:$0xf] %v537_v47  ;;  %540 = vst [vmem:[%s3217_s18 + $0xc0] sm:$0xf] %v539_v48 }
  0x44   : > { %542 = vst [vmem:[%s3217_s18 + $0xc4] sm:$0xf] %v541_v49  ;;  %v543_v50 = vld [vmem:[%s3213_s22 + $0x258] sm:$0xf]  ;;  %v545_v51 = vld [vmem:[%s3213_s22 + $0x264] sm:$0xf] }
  0x45   : > { %v547_v52 = vld [vmem:[%s3213_s22 + $0x270] sm:$0xf]  ;;  %544 = vst [vmem:[%s3217_s18 + $0xc8] sm:$0xf] %v543_v50  ;;  %546 = vst [vmem:[%s3217_s18 + $0xcc] sm:$0xf] %v545_v51 }
  0x46   : > { %548 = vst [vmem:[%s3217_s18 + $0xd0] sm:$0xf] %v547_v52  ;;  %v549_v53 = vld [vmem:[%s3213_s22 + $0x27c] sm:$0xf]  ;;  %v551_v54 = vld [vmem:[%s3213_s22 + $0x288] sm:$0xf] }
  0x47   : > { %v553_v55 = vld [vmem:[%s3213_s22 + $0x294] sm:$0xf]  ;;  %550 = vst [vmem:[%s3217_s18 + $0xd4] sm:$0xf] %v549_v53  ;;  %552 = vst [vmem:[%s3217_s18 + $0xd8] sm:$0xf] %v551_v54 }
  0x48   : > { %554 = vst [vmem:[%s3217_s18 + $0xdc] sm:$0xf] %v553_v55  ;;  %v555_v56 = vld [vmem:[%s3213_s22 + $0x2a0] sm:$0xf]  ;;  %v557_v57 = vld [vmem:[%s3213_s22 + $0x2ac] sm:$0xf] }
  0x49   : > { %v559_v58 = vld [vmem:[%s3213_s22 + $0x2b8] sm:$0xf]  ;;  %556 = vst [vmem:[%s3217_s18 + $0xe0] sm:$0xf] %v555_v56  ;;  %558 = vst [vmem:[%s3217_s18 + $0xe4] sm:$0xf] %v557_v57 }
  0x4a   : > { %560 = vst [vmem:[%s3217_s18 + $0xe8] sm:$0xf] %v559_v58  ;;  %v561_v59 = vld [vmem:[%s3213_s22 + $0x2c4] sm:$0xf]  ;;  %v563_v60 = vld [vmem:[%s3213_s22 + $0x2d0] sm:$0xf] }
  0x4b   : > { %v565_v61 = vld [vmem:[%s3213_s22 + $0x2dc] sm:$0xf]  ;;  %562 = vst [vmem:[%s3217_s18 + $0xec] sm:$0xf] %v561_v59  ;;  %564 = vst [vmem:[%s3217_s18 + $0xf0] sm:$0xf] %v563_v60 }
  0x4c   : > { %566 = vst [vmem:[%s3217_s18 + $0xf4] sm:$0xf] %v565_v61  ;;  %v567_v62 = vld [vmem:[%s3213_s22 + $0x2e8] sm:$0xf]  ;;  %v569_v63 = vld [vmem:[%s3213_s22 + $0x2f4] sm:$0xf] }
  0x4d   : > { %568 = vst [vmem:[%s3217_s18 + $0xf8] sm:$0xf] %v567_v62  ;;  %570 = vst [vmem:[%s3217_s18 + $0xfc] sm:$0xf] %v569_v63 }
  0x4e PF: > { %728 = sbr.rel (!%p3193_p5) target bundleno = 130 (0x82), region = 101  ;;  %s730_s26 = sand.u32 (%p3193_p5), 1, %s3068_s15  }
  0x4f   : > { %s2577_s27 = sshll.u32 (%p3193_p5), %s3072_s16, 2  ;;  %s2576_s28 = sshll.u32 (%p3193_p5), %s730_s26, 8 }
  0x50   : > { %s3859_s11 = sld [smem:[#allocation19_spill]] (%p3193_p5)  ;;  %s3356_s22 = scalar_lea.vmem (%p3193_p5), [#allocation4], %s2576_s28 }
  0x56   : > { %s3352_s9 = scalar_lea.vmem %s3859_s11, %s2577_s27 }
  0x57   : > { %v751_v0 = vld [vmem:[%s3352_s9] sm:$0xf]  ;;  %v753_v1 = vld [vmem:[%s3352_s9 + $0xc] sm:$0xf]  ;;  %v755_v2 = vld [vmem:[%s3352_s9 + $0x18] sm:$0xf] }
  0x58   : > { %752 = vst [vmem:[%s3356_s22] sm:$0xf] %v751_v0  ;;  %754 = vst [vmem:[%s3356_s22 + $0x4] sm:$0xf] %v753_v1  ;;  %v757_v3 = vld [vmem:[%s3352_s9 + $0x24] sm:$0xf] }
  0x59   : > { %v759_v4 = vld [vmem:[%s3352_s9 + $0x30] sm:$0xf]  ;;  %756 = vst [vmem:[%s3356_s22 + $0x8] sm:$0xf] %v755_v2  ;;  %758 = vst [vmem:[%s3356_s22 + $0xc] sm:$0xf] %v757_v3 }
  0x5a   : > { %760 = vst [vmem:[%s3356_s22 + $0x10] sm:$0xf] %v759_v4  ;;  %v761_v5 = vld [vmem:[%s3352_s9 + $0x3c] sm:$0xf]  ;;  %v763_v6 = vld [vmem:[%s3352_s9 + $0x48] sm:$0xf] }
  0x5b   : > { %v765_v7 = vld [vmem:[%s3352_s9 + $0x54] sm:$0xf]  ;;  %762 = vst [vmem:[%s3356_s22 + $0x14] sm:$0xf] %v761_v5  ;;  %764 = vst [vmem:[%s3356_s22 + $0x18] sm:$0xf] %v763_v6 }
  0x5c   : > { %766 = vst [vmem:[%s3356_s22 + $0x1c] sm:$0xf] %v765_v7  ;;  %v767_v8 = vld [vmem:[%s3352_s9 + $0x60] sm:$0xf]  ;;  %v769_v9 = vld [vmem:[%s3352_s9 + $0x6c] sm:$0xf] }
  0x5d   : > { %v771_v10 = vld [vmem:[%s3352_s9 + $0x78] sm:$0xf]  ;;  %768 = vst [vmem:[%s3356_s22 + $0x20] sm:$0xf] %v767_v8  ;;  %770 = vst [vmem:[%s3356_s22 + $0x24] sm:$0xf] %v769_v9 }
  0x5e   : > { %772 = vst [vmem:[%s3356_s22 + $0x28] sm:$0xf] %v771_v10  ;;  %v773_v11 = vld [vmem:[%s3352_s9 + $0x84] sm:$0xf]  ;;  %v775_v12 = vld [vmem:[%s3352_s9 + $0x90] sm:$0xf] }
  0x5f   : > { %v777_v13 = vld [vmem:[%s3352_s9 + $0x9c] sm:$0xf]  ;;  %774 = vst [vmem:[%s3356_s22 + $0x2c] sm:$0xf] %v773_v11  ;;  %776 = vst [vmem:[%s3356_s22 + $0x30] sm:$0xf] %v775_v12 }
  0x60   : > { %778 = vst [vmem:[%s3356_s22 + $0x34] sm:$0xf] %v777_v13  ;;  %v779_v14 = vld [vmem:[%s3352_s9 + $0xa8] sm:$0xf]  ;;  %v781_v15 = vld [vmem:[%s3352_s9 + $0xb4] sm:$0xf] }
  0x61   : > { %v783_v16 = vld [vmem:[%s3352_s9 + $0xc0] sm:$0xf]  ;;  %780 = vst [vmem:[%s3356_s22 + $0x38] sm:$0xf] %v779_v14  ;;  %782 = vst [vmem:[%s3356_s22 + $0x3c] sm:$0xf] %v781_v15 }
  0x62   : > { %784 = vst [vmem:[%s3356_s22 + $0x40] sm:$0xf] %v783_v16  ;;  %v785_v17 = vld [vmem:[%s3352_s9 + $0xcc] sm:$0xf]  ;;  %v787_v18 = vld [vmem:[%s3352_s9 + $0xd8] sm:$0xf] }
  0x63   : > { %v789_v19 = vld [vmem:[%s3352_s9 + $0xe4] sm:$0xf]  ;;  %786 = vst [vmem:[%s3356_s22 + $0x44] sm:$0xf] %v785_v17  ;;  %788 = vst [vmem:[%s3356_s22 + $0x48] sm:$0xf] %v787_v18 }
  0x64   : > { %790 = vst [vmem:[%s3356_s22 + $0x4c] sm:$0xf] %v789_v19  ;;  %v791_v20 = vld [vmem:[%s3352_s9 + $0xf0] sm:$0xf]  ;;  %v793_v21 = vld [vmem:[%s3352_s9 + $0xfc] sm:$0xf] }
  0x65   : > { %v795_v22 = vld [vmem:[%s3352_s9 + $0x108] sm:$0xf]  ;;  %792 = vst [vmem:[%s3356_s22 + $0x50] sm:$0xf] %v791_v20  ;;  %794 = vst [vmem:[%s3356_s22 + $0x54] sm:$0xf] %v793_v21 }
  0x66   : > { %796 = vst [vmem:[%s3356_s22 + $0x58] sm:$0xf] %v795_v22  ;;  %v797_v23 = vld [vmem:[%s3352_s9 + $0x114] sm:$0xf]  ;;  %v799_v24 = vld [vmem:[%s3352_s9 + $0x120] sm:$0xf] }
  0x67   : > { %v801_v25 = vld [vmem:[%s3352_s9 + $0x12c] sm:$0xf]  ;;  %798 = vst [vmem:[%s3356_s22 + $0x5c] sm:$0xf] %v797_v23  ;;  %800 = vst [vmem:[%s3356_s22 + $0x60] sm:$0xf] %v799_v24 }
  0x68   : > { %802 = vst [vmem:[%s3356_s22 + $0x64] sm:$0xf] %v801_v25  ;;  %v803_v26 = vld [vmem:[%s3352_s9 + $0x138] sm:$0xf]  ;;  %v805_v27 = vld [vmem:[%s3352_s9 + $0x144] sm:$0xf] }
  0x69   : > { %v807_v28 = vld [vmem:[%s3352_s9 + $0x150] sm:$0xf]  ;;  %804 = vst [vmem:[%s3356_s22 + $0x68] sm:$0xf] %v803_v26  ;;  %806 = vst [vmem:[%s3356_s22 + $0x6c] sm:$0xf] %v805_v27 }
  0x6a   : > { %808 = vst [vmem:[%s3356_s22 + $0x70] sm:$0xf] %v807_v28  ;;  %v809_v29 = vld [vmem:[%s3352_s9 + $0x15c] sm:$0xf]  ;;  %v811_v30 = vld [vmem:[%s3352_s9 + $0x168] sm:$0xf] }
  0x6b   : > { %v813_v31 = vld [vmem:[%s3352_s9 + $0x174] sm:$0xf]  ;;  %810 = vst [vmem:[%s3356_s22 + $0x74] sm:$0xf] %v809_v29  ;;  %812 = vst [vmem:[%s3356_s22 + $0x78] sm:$0xf] %v811_v30 }
  0x6c   : > { %814 = vst [vmem:[%s3356_s22 + $0x7c] sm:$0xf] %v813_v31  ;;  %v815_v32 = vld [vmem:[%s3352_s9 + $0x180] sm:$0xf]  ;;  %v817_v33 = vld [vmem:[%s3352_s9 + $0x18c] sm:$0xf] }
  0x6d   : > { %v819_v34 = vld [vmem:[%s3352_s9 + $0x198] sm:$0xf]  ;;  %816 = vst [vmem:[%s3356_s22 + $0x80] sm:$0xf] %v815_v32  ;;  %818 = vst [vmem:[%s3356_s22 + $0x84] sm:$0xf] %v817_v33 }
  0x6e   : > { %820 = vst [vmem:[%s3356_s22 + $0x88] sm:$0xf] %v819_v34  ;;  %v821_v35 = vld [vmem:[%s3352_s9 + $0x1a4] sm:$0xf]  ;;  %v823_v36 = vld [vmem:[%s3352_s9 + $0x1b0] sm:$0xf] }
  0x6f   : > { %v825_v37 = vld [vmem:[%s3352_s9 + $0x1bc] sm:$0xf]  ;;  %822 = vst [vmem:[%s3356_s22 + $0x8c] sm:$0xf] %v821_v35  ;;  %824 = vst [vmem:[%s3356_s22 + $0x90] sm:$0xf] %v823_v36 }
  0x70   : > { %826 = vst [vmem:[%s3356_s22 + $0x94] sm:$0xf] %v825_v37  ;;  %v827_v38 = vld [vmem:[%s3352_s9 + $0x1c8] sm:$0xf]  ;;  %v829_v39 = vld [vmem:[%s3352_s9 + $0x1d4] sm:$0xf] }
  0x71   : > { %v831_v40 = vld [vmem:[%s3352_s9 + $0x1e0] sm:$0xf]  ;;  %828 = vst [vmem:[%s3356_s22 + $0x98] sm:$0xf] %v827_v38  ;;  %830 = vst [vmem:[%s3356_s22 + $0x9c] sm:$0xf] %v829_v39 }
  0x72   : > { %832 = vst [vmem:[%s3356_s22 + $0xa0] sm:$0xf] %v831_v40  ;;  %v833_v41 = vld [vmem:[%s3352_s9 + $0x1ec] sm:$0xf]  ;;  %v835_v42 = vld [vmem:[%s3352_s9 + $0x1f8] sm:$0xf] }
  0x73   : > { %v837_v43 = vld [vmem:[%s3352_s9 + $0x204] sm:$0xf]  ;;  %834 = vst [vmem:[%s3356_s22 + $0xa4] sm:$0xf] %v833_v41  ;;  %836 = vst [vmem:[%s3356_s22 + $0xa8] sm:$0xf] %v835_v42 }
  0x74   : > { %838 = vst [vmem:[%s3356_s22 + $0xac] sm:$0xf] %v837_v43  ;;  %v839_v44 = vld [vmem:[%s3352_s9 + $0x210] sm:$0xf]  ;;  %v841_v45 = vld [vmem:[%s3352_s9 + $0x21c] sm:$0xf] }
  0x75   : > { %v843_v46 = vld [vmem:[%s3352_s9 + $0x228] sm:$0xf]  ;;  %840 = vst [vmem:[%s3356_s22 + $0xb0] sm:$0xf] %v839_v44  ;;  %842 = vst [vmem:[%s3356_s22 + $0xb4] sm:$0xf] %v841_v45 }
  0x76   : > { %844 = vst [vmem:[%s3356_s22 + $0xb8] sm:$0xf] %v843_v46  ;;  %v845_v47 = vld [vmem:[%s3352_s9 + $0x234] sm:$0xf]  ;;  %v847_v48 = vld [vmem:[%s3352_s9 + $0x240] sm:$0xf] }
  0x77   : > { %v849_v49 = vld [vmem:[%s3352_s9 + $0x24c] sm:$0xf]  ;;  %846 = vst [vmem:[%s3356_s22 + $0xbc] sm:$0xf] %v845_v47  ;;  %848 = vst [vmem:[%s3356_s22 + $0xc0] sm:$0xf] %v847_v48 }
  0x78   : > { %850 = vst [vmem:[%s3356_s22 + $0xc4] sm:$0xf] %v849_v49  ;;  %v851_v50 = vld [vmem:[%s3352_s9 + $0x258] sm:$0xf]  ;;  %v853_v51 = vld [vmem:[%s3352_s9 + $0x264] sm:$0xf] }
  0x79   : > { %v855_v52 = vld [vmem:[%s3352_s9 + $0x270] sm:$0xf]  ;;  %852 = vst [vmem:[%s3356_s22 + $0xc8] sm:$0xf] %v851_v50  ;;  %854 = vst [vmem:[%s3356_s22 + $0xcc] sm:$0xf] %v853_v51 }
  0x7a   : > { %856 = vst [vmem:[%s3356_s22 + $0xd0] sm:$0xf] %v855_v52  ;;  %v857_v53 = vld [vmem:[%s3352_s9 + $0x27c] sm:$0xf]  ;;  %v859_v54 = vld [vmem:[%s3352_s9 + $0x288] sm:$0xf] }
  0x7b   : > { %v861_v55 = vld [vmem:[%s3352_s9 + $0x294] sm:$0xf]  ;;  %858 = vst [vmem:[%s3356_s22 + $0xd4] sm:$0xf] %v857_v53  ;;  %860 = vst [vmem:[%s3356_s22 + $0xd8] sm:$0xf] %v859_v54 }
  0x7c   : > { %862 = vst [vmem:[%s3356_s22 + $0xdc] sm:$0xf] %v861_v55  ;;  %v863_v56 = vld [vmem:[%s3352_s9 + $0x2a0] sm:$0xf]  ;;  %v865_v57 = vld [vmem:[%s3352_s9 + $0x2ac] sm:$0xf] }
  0x7d   : > { %v867_v58 = vld [vmem:[%s3352_s9 + $0x2b8] sm:$0xf]  ;;  %864 = vst [vmem:[%s3356_s22 + $0xe0] sm:$0xf] %v863_v56  ;;  %866 = vst [vmem:[%s3356_s22 + $0xe4] sm:$0xf] %v865_v57 }
  0x7e   : > { %868 = vst [vmem:[%s3356_s22 + $0xe8] sm:$0xf] %v867_v58  ;;  %v869_v59 = vld [vmem:[%s3352_s9 + $0x2c4] sm:$0xf]  ;;  %v871_v60 = vld [vmem:[%s3352_s9 + $0x2d0] sm:$0xf] }
  0x7f   : > { %v873_v61 = vld [vmem:[%s3352_s9 + $0x2dc] sm:$0xf]  ;;  %870 = vst [vmem:[%s3356_s22 + $0xec] sm:$0xf] %v869_v59  ;;  %872 = vst [vmem:[%s3356_s22 + $0xf0] sm:$0xf] %v871_v60 }
  0x80   : > { %874 = vst [vmem:[%s3356_s22 + $0xf4] sm:$0xf] %v873_v61  ;;  %v875_v62 = vld [vmem:[%s3352_s9 + $0x2e8] sm:$0xf]  ;;  %v877_v63 = vld [vmem:[%s3352_s9 + $0x2f4] sm:$0xf] }
  0x81   : > { %876 = vst [vmem:[%s3356_s22 + $0xf8] sm:$0xf] %v875_v62  ;;  %878 = vst [vmem:[%s3356_s22 + $0xfc] sm:$0xf] %v877_v63 }
  0x82 PF: > { %p2578_p10 = scmp.ge.s32.totalorder %s3072_s16, 1  ;;  %p1035_p11 = scmp.lt.s32.totalorder %s3072_s16, 4 }
  0x84   : > { %p1036_p12 = pnand %p2578_p10, %p1035_p11 }
  0x85   : > { %s3487_s23 = sand.u32 (!%p1036_p12), 1, %s3064_s30   ;;  %p1109_p13 = scmp.lt.s32.totalorder (!%p1036_p12), %s3175_s17, 2 }
  0x86   : > { %1039 = sbr.rel (%p1036_p12) target bundleno = 974 (0x3ce), region = 146  ;;  %s2579_s18 = sshll.u32 (!%p1036_p12), %s3487_s23, 8 }
  0x87   : > { %s2581_s9 = sshll.u32 (!%p1036_p12), %s3487_s23, 3  ;;  %s3503_s15 = scalar_lea.vmem (!%p1036_p12), [#allocation3], %s2579_s18 }
  0x88   : > { %s3505_s30 = scalar_lea.vmem (!%p1036_p12), [#allocation4], %s2579_s18  ;;  %s3507_s19 = scalar_lea.vmem (!%p1036_p12), [#allocation5], %s2581_s9 }
  0x89   : > { %s3509_s25 = scalar_lea.vmem (!%p1036_p12), [#allocation7], %s2581_s9  ;;  %p2583_p0 = scmp.ne.s32.totalorder (!%p1036_p12), %s3175_s17, 0 }
  0x8b   : > { %s3493_s26 = scalar_select %p1109_p13, %s3175_s17, 2 }
  0x8c   : > { %1119 = sbr.rel (%p2583_p0) target bundleno = 641 (0x281), region = 158 }
  0x91   : > { %v2848_v0 = vld [vmem:[%s3824_s1 + $0x8] sm:$0xff]   ;;  %v3074_v1 = vmov 0.0   ;;  %v2849_v2 = vld [vmem:[%s3824_s1] sm:$0xff]   ;;  %vm3075_vm0 = vmmov 0   ;;  %vm1145_vm1 = vcmask 261120   ;;  %v3076_v27 = vmov 0  }
  0x92   : > { %2793 = vmatprep.subr.bf16.mxu0 %v3074_v1  ;;  %2797 = vmatprep.mubr.msk.bf16.mxu0 %vm3075_vm0, %v3074_v1  ;;  %v1120_v3 = vld [vmem:[%s3823_s0] sm:$0xff]  ;;  %v2854_v6 = vld [vmem:[%s3828_s5 + $0xec] ss:$16 sps:$4 sm:$0xff]   ;;  %v2852_v7 = vld [vmem:[%s3828_s5 + $0xe8] ss:$16 sps:$4 sm:$0xff]  }
  0x93   : > { %2794 = vmatpush3.bf16.msra.mxu0 %v2848_v0  ;;  %v1121_v4 = vpack.c.bf16 %v1120_v3, %v1120_v3  ;;  %v2850_v5 = vld [vmem:[%s3828_s5 + $0xe4] ss:$16 sps:$4 sm:$0xff]   ;;  %v2855_v8 = vld [vmem:[%s3828_s5 + $0xe0] ss:$16 sps:$4 sm:$0xff]   ;;  %v2860_v10 = vld [vmem:[%s3828_s5 + $0xcc] ss:$16 sps:$4 sm:$0xff]   ;;  %1475 = vmatprep.mubr.bf16.mxu1 %v3076_v27 }
  0x94   : > { %2795 = vmatprep.subr.bf16.mxu0 %v3074_v1  ;;  %1443 = vmatprep.subr.bf16.mxu1 %v2850_v5  ;;  %v2856_v9 = vld [vmem:[%s3828_s5 + $0xc4] ss:$16 sps:$4 sm:$0xff]   ;;  %v2858_v11 = vld [vmem:[%s3828_s5 + $0xc8] ss:$16 sps:$4 sm:$0xff]   ;;  %v2861_v12 = vld [vmem:[%s3828_s5 + $0xc0] ss:$16 sps:$4 sm:$0xff]  }
  0x95   : > { %1444 = vmatpush1.bf16.msra.mxu1 %v2855_v8  ;;  %v2862_v13 = vld [vmem:[%s3828_s5 + $0xa4] ss:$16 sps:$4 sm:$0xff]   ;;  %v2866_v14 = vld [vmem:[%s3828_s5 + $0xac] ss:$16 sps:$4 sm:$0xff]   ;;  %v2864_v15 = vld [vmem:[%s3828_s5 + $0xa8] ss:$16 sps:$4 sm:$0xff]   ;;  %v1263_v8 = vlaneseq }
  0x96   : > { %1445 = vmatprep.subr.bf16.mxu1 %v2856_v9  ;;  %v2867_v16 = vld [vmem:[%s3828_s5 + $0xa0] ss:$16 sps:$4 sm:$0xff]   ;;  %v2868_v17 = vld [vmem:[%s3828_s5 + $0x84] ss:$16 sps:$4 sm:$0xff]   ;;  %v2872_v18 = vld [vmem:[%s3828_s5 + $0x8c] ss:$16 sps:$4 sm:$0xff]  }
  0x97   : > { %2796 = vmatpush3.bf16.msra.mxu0 %v2849_v2  ;;  %v2870_v19 = vld [vmem:[%s3828_s5 + $0x88] ss:$16 sps:$4 sm:$0xff]   ;;  %v2873_v20 = vld [vmem:[%s3828_s5 + $0x80] ss:$16 sps:$4 sm:$0xff]   ;;  %v2874_v21 = vld [vmem:[%s3828_s5 + $0x64] ss:$16 sps:$4 sm:$0xff]  }
  0x98   : > { %1484 = vmatprep.subr.bf16.mxu0 %v2854_v6  ;;  %v2878_v22 = vld [vmem:[%s3828_s5 + $0x6c] ss:$16 sps:$4 sm:$0xff]   ;;  %v2876_v23 = vld [vmem:[%s3828_s5 + $0x68] ss:$16 sps:$4 sm:$0xff]   ;;  %v2879_v24 = vld [vmem:[%s3828_s5 + $0x60] ss:$16 sps:$4 sm:$0xff]  }
  0x99   : > { %1446 = vmatpush1.bf16.msra.mxu1 %v2861_v12  ;;  %v2880_v25 = vld [vmem:[%s3828_s5 + $0x44] ss:$16 sps:$4 sm:$0xff]   ;;  %v2884_v26 = vld [vmem:[%s3828_s5 + $0x4c] ss:$16 sps:$4 sm:$0xff]   ;;  %v2882_v28 = vld [vmem:[%s3828_s5 + $0x48] ss:$16 sps:$4 sm:$0xff]  }
  0x9a   : > { %2798 = vmatmul.mubr.msk.bf16.vlgmr.msra.gmra.mxu0 %vm1145_vm1, %v1121_v4  ;;  %1447 = vmatprep.subr.bf16.mxu1 %v2862_v13  ;;  %v2885_v29 = vld [vmem:[%s3828_s5 + $0x40] ss:$16 sps:$4 sm:$0xff]   ;;  %v2886_v30 = vld [vmem:[%s3828_s5 + $0x24] ss:$16 sps:$4 sm:$0xff]   ;;  %v2890_v31 = vld [vmem:[%s3828_s5 + $0x2c] ss:$16 sps:$4 sm:$0xff]  }
  0x9b   : > { %1485 = vmatpush1.bf16.msra.mxu0 %v2852_v7  ;;  %1516 = vmatprep.mubr.bf16.mxu0 %v3076_v27  ;;  %v2888_v32 = vld [vmem:[%s3828_s5 + $0x28] ss:$16 sps:$4 sm:$0xff]   ;;  %v2891_v33 = vld [vmem:[%s3828_s5 + $0x20] ss:$16 sps:$4 sm:$0xff]   ;;  %v2892_v34 = vld [vmem:[%s3828_s5 + $0x4] ss:$16 sps:$4 sm:$0xff]  }
  0x9c   : > { %1486 = vmatprep.subr.bf16.mxu0 %v2860_v10  ;;  %v2896_v35 = vld [vmem:[%s3828_s5 + $0xc] ss:$16 sps:$4 sm:$0xff]   ;;  %v2894_v36 = vld [vmem:[%s3828_s5 + $0x8] ss:$16 sps:$4 sm:$0xff]   ;;  %v2897_v37 = vld [vmem:[%s3828_s5] ss:$16 sps:$4 sm:$0xff]  }
  0x9d   : > { %1448 = vmatpush1.bf16.msra.mxu1 %v2867_v16  ;;  %v2584_v38 = vld [vmem:[%s3825_s2] ss:$0 sm:$0xff]  ;;  %v1264_v9 = vshrl.u32 %v1263_v8, 7 }
  0x9e   : > { %1449 = vmatprep.subr.bf16.mxu1 %v2868_v17  ;;  %v2588_v1 = vld [vmem:[%s3826_s3] ss:$0 sm:$0xff] }
  0x9f   : > { %1487 = vmatpush1.bf16.msra.mxu0 %v2858_v11  ;;  %v2589_v3 = vld [vmem:[%s3827_s4] ss:$0 sm:$0xff]  ;;  %v3626_v10 = vsub.s32 0, %v1264_v9  ;;  %v3628_v11 = vsub.s32 2, %v1264_v9  ;;  %v3633_v13 = vsub.s32 1, %v1264_v9 }
  0xa0   : > { %1488 = vmatprep.subr.bf16.mxu0 %v2866_v14  ;;  %v1261_v12 = vld [vmem:[%s3829_s6] sm:$0xf]  ;;  %v3635_v14 = vsub.s32 3, %v1264_v9 }
  0xa1   : > { %1450 = vmatpush1.bf16.msra.mxu1 %v2873_v20  ;;  %v1274_v16 = vrot.slane %v1261_v12, %v3628_v11 }
  0xa2   : > { %1451 = vmatprep.subr.bf16.mxu1 %v2874_v21  ;;  %v1278_v20 = vrot.slane %v1261_v12, %v3635_v14 }
  0xa3   : > { %1489 = vmatpush1.bf16.msra.mxu0 %v2864_v15  ;;  %v1266_v15 = vrot.slane %v1261_v12, %v3626_v10 }
  0xa4   : > { %1490 = vmatprep.subr.bf16.mxu0 %v2872_v18 }
  0xa5   : > { %1452 = vmatpush1.bf16.msra.mxu1 %v2879_v24 }
  0xa6   : > { %1453 = vmatprep.subr.bf16.mxu1 %v2880_v25 }
  0xa7   : > { %1491 = vmatpush1.bf16.msra.mxu0 %v2870_v19  ;;  %v1270_v19 = vrot.slane %v1261_v12, %v3633_v13 }
  0xa8   : > { %1492 = vmatprep.subr.bf16.mxu0 %v2878_v22 }
  0xa9   : > { %1454 = vmatpush1.bf16.msra.mxu1 %v2885_v29 }
  0xaa   : > { %1455 = vmatprep.subr.bf16.mxu1 %v2886_v30 }
  0xab   : > { %1493 = vmatpush1.bf16.msra.mxu0 %v2876_v23 }
  0xac   : > { %1494 = vmatprep.subr.bf16.mxu0 %v2884_v26 }
  0xad   : > { %1456 = vmatpush1.bf16.msra.mxu1 %v2891_v33 }
  0xae   : > { %1457 = vmatprep.subr.bf16.mxu1 %v2892_v34 }
  0xaf   : > { %1495 = vmatpush1.bf16.msra.mxu0 %v2882_v28 }
  0xb0   : > { %1496 = vmatprep.subr.bf16.mxu0 %v2890_v31 }
  0xb1   : > { %1458 = vmatpush1.bf16.msra.mxu1 %v2897_v37 }
  0xb3   : > { %1497 = vmatpush1.bf16.msra.mxu0 %v2888_v32 }
  0xb4   : > { %1498 = vmatprep.subr.bf16.mxu0 %v2896_v35 }
  0xb7   : > { %1499 = vmatpush1.bf16.msra.mxu0 %v2894_v36 }
 0x15a   : > { %v1183_v39 = vpop.f32.mrf.mxu0 }
 0x15b   : > { %v1184_v40 = vadd.f32 %v2584_v38, %v1183_v39 }
 0x15c   : > { %v2799_v41 = vpop.f32.mrf.mxu0 }
 0x15d   : > { %v1191_v42 = vrot.slane %v1184_v40, 4  ;;  %v1198_v43 = vmul.f32 %v1184_v40, %v1184_v40 }
 0x15e   : > { %v1186_v44 = vpop.f32.mrf.mxu0 }
 0x15f   : > { %v1192_v45 = vadd.f32 %v1191_v42, %v1184_v40  ;;  %v1199_v46 = vrot.slane %v1198_v43, 4 }
 0x160   : > { %v2800_v47 = vpop.f32.mrf.mxu0 }
 0x161   : > { %v1193_v48 = vrot.slane %v1192_v45, 2  ;;  %v1200_v49 = vadd.f32 %v1199_v46, %v1198_v43 }
 0x163   : > { %v1194_v50 = vadd.f32 %v1193_v48, %v1192_v45  ;;  %v1201_v51 = vrot.slane %v1200_v49, 2 }
 0x165   : > { %v1195_v52 = vrot.slane %v1194_v50, 1  ;;  %v1202_v53 = vadd.f32 %v1201_v51, %v1200_v49 }
 0x167   : > { %v1196_v54 = vadd.f32 %v1195_v52, %v1194_v50  ;;  %v1203_v55 = vrot.slane %v1202_v53, 1 }
 0x169   : > { %v1197_v56 = vmul.f32 0.125, %v1196_v54  ;;  %v1204_v57 = vadd.f32 %v1203_v55, %v1202_v53 }
 0x16b   : > { %v1205_v58 = vmul.f32 0.125, %v1204_v57  ;;  %v1206_v59 = vmul.f32 %v1197_v56, %v1197_v56  ;;  %v1209_v63 = vsub.f32 %v1184_v40, %v1197_v56 }
 0x16d   : > { %v1207_v60 = vsub.f32 %v1205_v58, %v1206_v59 }
 0x16f   : > { %v1208_v61 = vmax.f32 %v1207_v60, 0.0 }
 0x171   : > { %v1210_v62 = vadd.f32 1e-05, %v1208_v61 }
 0x173   : > { %2898 = vrsqrt.f32 %v1210_v62 }
 0x180   : > { %v2899_v0 = vpop.eup %2898 }
 0x181   : > { %v1212_v2 = vmul.f32 %v2899_v0, %v1209_v63 }
 0x183   : > { %v1219_v4 = vmul.f32 %v2588_v1, %v1212_v2 }
 0x185   : > { %v1226_v5 = vadd.f32 %v2589_v3, %v1219_v4 }
 0x187   : > { %v1227_v6 = vmax.f32 %v1226_v5, 0.0 }
 0x189   : > { %v1228_v7 = vpack.c.bf16 %v1227_v6, %v1227_v6 }
 0x18b   : > { %1476 = vmatmul.mubr.bf16.vlgmr.msra.gmra.mxu1 %v1228_v7  ;;  %1517 = vmatmul.mubr.bf16.vlgmr.msra.gmra.mxu0 %v1228_v7 }
 0x24b   : > { %v1477_v17 = vpop.f32.mrf.mxu1  ;;  %v1518_v18 = vpop.f32.mrf.mxu0 }
 0x24c   : > { %v3641_v21 = vadd.f32 %v1477_v17, %v1266_v15  ;;  %v3643_v22 = vadd.f32 %v1518_v18, %v1274_v16 }
 0x24d   : > { %v1479_v23 = vpop.f32.mrf.mxu1  ;;  %v1520_v24 = vpop.f32.mrf.mxu0 }
 0x24e   : > { %v1527_v25 = vrot.slane %v3641_v21, 4  ;;  %v1555_v26 = vmul.f32 %v3641_v21, %v3641_v21  ;;  %v1539_v27 = vrot.slane %v3643_v22, 4  ;;  %v1557_v28 = vmul.f32 %v3643_v22, %v3643_v22 }
 0x24f   : > { %v3651_v29 = vadd.f32 %v1479_v23, %v1270_v19  ;;  %v3653_v30 = vadd.f32 %v1520_v24, %v1278_v20  ;;  %v1481_v31 = vpop.f32.mrf.mxu1  ;;  %v1522_v32 = vpop.f32.mrf.mxu0 }
 0x250   : > { %v1528_v33 = vadd.f32 %v1527_v25, %v3641_v21  ;;  %v1559_v34 = vrot.slane %v1555_v26, 4  ;;  %v1540_v35 = vadd.f32 %v1539_v27, %v3643_v22  ;;  %v1571_v36 = vrot.slane %v1557_v28, 4 }
 0x251   : > { %v1533_v37 = vrot.slane %v3651_v29, 4  ;;  %v1556_v38 = vmul.f32 %v3651_v29, %v3651_v29  ;;  %v1545_v39 = vrot.slane %v3653_v30, 4  ;;  %v1558_v40 = vmul.f32 %v3653_v30, %v3653_v30  ;;  %v1482_v41 = vpop.f32.mrf.mxu1  ;;  %v1523_v42 = vpop.f32.mrf.mxu0 }
 0x252   : > { %v1529_v43 = vrot.slane %v1528_v33, 2  ;;  %v1560_v44 = vadd.f32 %v1559_v34, %v1555_v26  ;;  %v1541_v45 = vrot.slane %v1540_v35, 2  ;;  %v1572_v46 = vadd.f32 %v1571_v36, %v1557_v28 }
 0x253   : > { %v1534_v47 = vadd.f32 %v1533_v37, %v3651_v29  ;;  %v1565_v48 = vrot.slane %v1556_v38, 4  ;;  %v1546_v49 = vadd.f32 %v1545_v39, %v3653_v30  ;;  %v1577_v50 = vrot.slane %v1558_v40, 4 }
 0x254   : > { %v1530_v51 = vadd.f32 %v1529_v43, %v1528_v33  ;;  %v1561_v52 = vrot.slane %v1560_v44, 2  ;;  %v1542_v53 = vadd.f32 %v1541_v45, %v1540_v35  ;;  %v1573_v54 = vrot.slane %v1572_v46, 2 }
 0x255   : > { %v1535_v55 = vrot.slane %v1534_v47, 2  ;;  %v1566_v56 = vadd.f32 %v1565_v48, %v1556_v38  ;;  %v1547_v57 = vrot.slane %v1546_v49, 2  ;;  %v1578_v58 = vadd.f32 %v1577_v50, %v1558_v40 }
 0x256   : > { %v1531_v59 = vrot.slane %v1530_v51, 1  ;;  %v1562_v60 = vadd.f32 %v1561_v52, %v1560_v44  ;;  %v1543_v61 = vrot.slane %v1542_v53, 1  ;;  %v1574_v62 = vadd.f32 %v1573_v54, %v1572_v46  ;;  %v1526_v52 = vld [vmem:[%s3831_s8] sm:$0xf] }
 0x257   : > { %v1536_v63 = vadd.f32 %v1535_v55, %v1534_v47  ;;  %v1567_v0 = vrot.slane %v1566_v56, 2  ;;  %v1548_v1 = vadd.f32 %v1547_v57, %v1546_v49  ;;  %v1579_v2 = vrot.slane %v1578_v58, 2 }
 0x258   : > { %v1532_v3 = vadd.f32 %v1531_v59, %v1530_v51  ;;  %v1563_v4 = vrot.slane %v1562_v60, 1  ;;  %v1544_v5 = vadd.f32 %v1543_v61, %v1542_v53  ;;  %v1575_v6 = vrot.slane %v1574_v62, 1  ;;  %v1525_v51 = vld [vmem:[%s3830_s7] sm:$0xf] }
 0x259   : > { %v1537_v7 = vrot.slane %v1536_v63, 1  ;;  %v1568_v8 = vadd.f32 %v1567_v0, %v1566_v56  ;;  %v1549_v9 = vrot.slane %v1548_v1, 1  ;;  %v1580_v12 = vadd.f32 %v1579_v2, %v1578_v58 }
 0x25a   : > { %v1551_v15 = vmul.f32 0.125, %v1532_v3  ;;  %v1564_v16 = vadd.f32 %v1563_v4, %v1562_v60  ;;  %v1553_v17 = vmul.f32 0.125, %v1544_v5  ;;  %v1576_v18 = vadd.f32 %v1575_v6, %v1574_v62 }
 0x25b   : > { %v1538_v19 = vadd.f32 %v1537_v7, %v1536_v63  ;;  %v1569_v20 = vrot.slane %v1568_v8, 1  ;;  %v1550_v23 = vadd.f32 %v1549_v9, %v1548_v1  ;;  %v1581_v24 = vrot.slane %v1580_v12, 1 }
 0x25c   : > { %v1583_v25 = vmul.f32 0.125, %v1564_v16  ;;  %v1587_v26 = vmul.f32 %v1551_v15, %v1551_v15  ;;  %v1585_v27 = vmul.f32 0.125, %v1576_v18  ;;  %v1589_v28 = vmul.f32 %v1553_v17, %v1553_v17 }
 0x25d   : > { %v1552_v31 = vmul.f32 0.125, %v1538_v19  ;;  %v1570_v32 = vadd.f32 %v1569_v20, %v1568_v8  ;;  %v1554_v34 = vmul.f32 0.125, %v1550_v23  ;;  %v1582_v35 = vadd.f32 %v1581_v24, %v1580_v12 }
 0x25e   : > { %v1591_v33 = vsub.f32 %v1583_v25, %v1587_v26  ;;  %v1593_v36 = vsub.f32 %v1585_v27, %v1589_v28  ;;  %v1599_v53 = vsub.f32 %v3641_v21, %v1551_v15  ;;  %v1619_v54 = vrot.slane %v1525_v51, %v3626_v10 }
 0x25f   : > { %v1584_v37 = vmul.f32 0.125, %v1570_v32  ;;  %v1588_v38 = vmul.f32 %v1552_v31, %v1552_v31  ;;  %v1586_v40 = vmul.f32 0.125, %v1582_v35  ;;  %v1590_v41 = vmul.f32 %v1554_v34, %v1554_v34 }
 0x260   : > { %v1595_v39 = vmax.f32 %v1591_v33, 0.0  ;;  %v1597_v42 = vmax.f32 %v1593_v36, 0.0  ;;  %v1601_v56 = vsub.f32 %v3643_v22, %v1553_v17  ;;  %v1627_v57 = vrot.slane %v1525_v51, %v3628_v11 }
 0x261   : > { %v1592_v43 = vsub.f32 %v1584_v37, %v1588_v38  ;;  %v1594_v45 = vsub.f32 %v1586_v40, %v1590_v41  ;;  %v1644_v60 = vrot.slane %v1526_v52, %v3626_v10  ;;  %v1600_v62 = vsub.f32 %v3651_v29, %v1552_v31 }
 0x262   : > { %v1603_v44 = vadd.f32 1e-05, %v1595_v39  ;;  %v1605_v46 = vadd.f32 1e-05, %v1597_v42  ;;  %v1623_v63 = vrot.slane %v1525_v51, %v3633_v13  ;;  %v1652_v21 = vrot.slane %v1526_v52, %v3628_v11 }
 0x263   : > { %v1596_v47 = vmax.f32 %v1592_v43, 0.0  ;;  %v1598_v48 = vmax.f32 %v1594_v45, 0.0  ;;  %v1602_v2 = vsub.f32 %v3653_v30, %v1554_v34  ;;  %v1631_v3 = vrot.slane %v1525_v51, %v3635_v14 }
 0x264   : > { %2900 = vrsqrt.f32 %v1603_v44  ;;  %v1648_v6 = vrot.slane %v1526_v52, %v3633_v13  ;;  %v1656_v10 = vrot.slane %v1526_v52, %v3635_v14 }
 0x265   : > { %2902 = vrsqrt.f32 %v1605_v46  ;;  %v1604_v49 = vadd.f32 1e-05, %v1596_v47  ;;  %v1606_v50 = vadd.f32 1e-05, %v1598_v48 }
 0x267   : > { %2904 = vrsqrt.f32 %v1604_v49 }
 0x268   : > { %2906 = vrsqrt.f32 %v1606_v50 }
 0x271   : > { %v2901_v55 = vpop.eup %2900 }
 0x272   : > { %v2903_v58 = vpop.eup %2902  ;;  %v1611_v59 = vmul.f32 %v2901_v55, %v1599_v53 }
 0x273   : > { %v1613_v61 = vmul.f32 %v2903_v58, %v1601_v56 }
 0x274   : > { %v2905_v0 = vpop.eup %2904  ;;  %v1636_v1 = vmul.f32 %v1619_v54, %v1611_v59 }
 0x275   : > { %v2907_v22 = vpop.eup %2906  ;;  %v1638_v4 = vmul.f32 %v1627_v57, %v1613_v61  ;;  %v1612_v5 = vmul.f32 %v2905_v0, %v1600_v62 }
 0x276   : > { %v1614_v7 = vmul.f32 %v2907_v22, %v1602_v2  ;;  %v1661_v8 = vadd.f32 %v1644_v60, %v1636_v1 }
 0x277   : > { %v1637_v29 = vmul.f32 %v1623_v63, %v1612_v5  ;;  %v1663_v9 = vadd.f32 %v1652_v21, %v1638_v4 }
 0x278   : > { %v1639_v12 = vmul.f32 %v1631_v3, %v1614_v7  ;;  %v1665_v17 = vmax.f32 %v1661_v8, 0.0 }
 0x279   : > { %v1662_v15 = vadd.f32 %v1648_v6, %v1637_v29  ;;  %v1667_v18 = vmax.f32 %v1663_v9, 0.0 }
 0x27a   : > { %v1664_v16 = vadd.f32 %v1656_v10, %v1639_v12 }
 0x27b   : > { %v1666_v11 = vmax.f32 %v1662_v15, 0.0 }
 0x27c   : > { %v1668_v30 = vmax.f32 %v1664_v16, 0.0 }
 0x27d   : > { %v2700_v19 = vpack.c.bf16 %v1666_v11, %v1665_v17 }
 0x27e   : > { %v2701_v20 = vpack.c.bf16 %v1668_v30, %v1667_v18 }
 0x27f   : > { %1685 = vst [vmem:[#allocation2] sm:$0xff] %v2700_v19 }
 0x280   : > { %1686 = vst [vmem:[#allocation2 + $0x8] sm:$0xff] %v2701_v20 }
 0x281 PF: > { %v2908_v13 = vld [vmem:[%s3503_s15 + $0x78] sm:$0xff]   ;;  %v2912_v25 = vld [vmem:[%s3503_s15 + $0x70] sm:$0xff]   ;;  %v2916_v31 = vld [vmem:[%s3503_s15 + $0x68] sm:$0xff]   ;;  %s3860_s18 = scalar_lea.vmem %s3833_s10, %s3493_s26  ;;  %s2425_s20 = sshll.u32 %s3507_s19, 4  ;;  %s2426_s20 = int_to_ptr.vmem [resolvable:$true] %s2425_s20 }
 0x282   : > { %v2909_v14 = vld [vmem:[%s3503_s15 + $0xf8] sm:$0xff]   ;;  %2705 = vmatprep.subr.bf16.mxu0 %v2908_v13  ;;  %v2913_v26 = vld [vmem:[%s3503_s15 + $0xf0] sm:$0xff]   ;;  %v2917_v32 = vld [vmem:[%s3503_s15 + $0xe8] sm:$0xff]   ;;  %s2407_s9 = scalar_lea.sflag [#allocation6], %s3487_s23  ;;  %s2982_s22 = scalar_lea.vmem %s2426_s20, 128 }
 0x283   : > { %v2910_v23 = vld [vmem:[%s3503_s15 + $0x38] sm:$0xff]   ;;  %2727 = vmatprep.subr.bf16.mxu1 %v2909_v14  ;;  %v2914_v27 = vld [vmem:[%s3503_s15 + $0x30] sm:$0xff]   ;;  %v2918_v33 = vld [vmem:[%s3503_s15 + $0x28] sm:$0xff]   ;;  %p2983_p1 = scmp.ne.s32.totalorder %s2426_s20, %s2982_s22  ;;  %s3077_s27 = smov [#allocation5]  }
 0x284   : > { %v2911_v24 = vld [vmem:[%s3503_s15 + $0xb8] sm:$0xff]   ;;  %2706 = vmatpush3.bf16.msra.mxu0 %v2910_v23  ;;  %v2915_v28 = vld [vmem:[%s3503_s15 + $0xb0] sm:$0xff]   ;;  %v2919_v34 = vld [vmem:[%s3503_s15 + $0xa8] sm:$0xff]   ;;  %s2986_s28 = sshll.u32 %s3077_s27, 4  ;;  %s2987_s28 = int_to_ptr.vmem [resolvable:$false] %s2986_s28 }
 0x285   : > { %2728 = vmatpush3.bf16.msra.mxu1 %v2911_v24  ;;  %2707 = vmatprep.subr.bf16.mxu0 %v2912_v25  ;;  %v2920_v35 = vld [vmem:[%s3503_s15 + $0x60] sm:$0xff]   ;;  %v2924_v39 = vld [vmem:[%s3503_s15 + $0x58] sm:$0xff]   ;;  %v2928_v43 = vld [vmem:[%s3503_s15 + $0x50] sm:$0xff]   ;;  %p2984_p2 = pnand %p2983_p1, %p3197_p6  ;;  %p2989_p4 = scmp.lt.s32.totalorder %s2426_s20, %s2987_s28 }
 0x286   : > { %2729 = vmatprep.subr.bf16.mxu1 %v2913_v26  ;;  %v2921_v36 = vld [vmem:[%s3503_s15 + $0xe0] sm:$0xff]   ;;  %v2925_v40 = vld [vmem:[%s3503_s15 + $0xd8] sm:$0xff]   ;;  %v2929_v44 = vld [vmem:[%s3503_s15 + $0xd0] sm:$0xff]  }
 0x287   : > { %v2922_v37 = vld [vmem:[%s3503_s15 + $0x20] sm:$0xff]   ;;  %v2926_v41 = vld [vmem:[%s3503_s15 + $0x18] sm:$0xff]   ;;  %v2930_v45 = vld [vmem:[%s3503_s15 + $0x10] sm:$0xff]   ;;  %p2985_p3 = pneg %p2984_p2 }
 0x288   : > { %2708 = vmatpush3.bf16.msra.mxu0 %v2914_v27  ;;  %v2923_v38 = vld [vmem:[%s3503_s15 + $0xa0] sm:$0xff]   ;;  %v2927_v42 = vld [vmem:[%s3503_s15 + $0x98] sm:$0xff]   ;;  %v2931_v46 = vld [vmem:[%s3503_s15 + $0x90] sm:$0xff]  }
 0x289   : > { %2730 = vmatpush3.bf16.msra.mxu1 %v2915_v28  ;;  %2709 = vmatprep.subr.bf16.mxu0 %v2916_v31  ;;  %v2932_v47 = vld [vmem:[%s3503_s15 + $0x48] sm:$0xff]   ;;  %v2936_v51 = vld [vmem:[%s3503_s15 + $0x40] sm:$0xff]   ;;  %v1687_v55 = vld [vmem:[#allocation2] sm:$0xff] }
 0x28a   : > { %2731 = vmatprep.subr.bf16.mxu1 %v2917_v32  ;;  %v2933_v48 = vld [vmem:[%s3503_s15 + $0xc8] sm:$0xff]   ;;  %v2937_v52 = vld [vmem:[%s3503_s15 + $0xc0] sm:$0xff]   ;;  %v1688_v56 = vld [vmem:[#allocation2 + $0x8] sm:$0xff]  ;;  %v3715_v57 = vcombine.low %v1687_v55, %v1687_v55  ;;  %v2626_v58 = vcombine.high %v1687_v55, %v1687_v55 }
 0x28b   : > { %v2934_v49 = vld [vmem:[%s3503_s15 + $0x8] sm:$0xff]   ;;  %v2938_v53 = vld [vmem:[%s3503_s15] sm:$0xff]   ;;  %v3717_v59 = vcombine.low %v1688_v56, %v1688_v56  ;;  %v2628_v60 = vcombine.high %v1688_v56, %v1688_v56  ;;  %v2944_v61 = vld [vmem:[%s3505_s30 + $0x78] sm:$0xff]  }
 0x28c   : > { %2710 = vmatpush3.bf16.msra.mxu0 %v2918_v33  ;;  %v2935_v50 = vld [vmem:[%s3503_s15 + $0x88] sm:$0xff]   ;;  %v2939_v54 = vld [vmem:[%s3503_s15 + $0x80] sm:$0xff]   ;;  %v2945_v62 = vld [vmem:[%s3505_s30 + $0xf8] sm:$0xff]   ;;  %1998 = vmatprep.mubr.bf16.mxu0 %v2626_v58  ;;  %s2988_s15 = scalar_lea.vmem %s2987_s28, 256 }
 0x28d   : > { %2732 = vmatpush3.bf16.msra.mxu1 %v2919_v34  ;;  %2711 = vmatprep.subr.bf16.mxu0 %v2920_v35  ;;  %v2946_v63 = vld [vmem:[%s3505_s30 + $0x38] sm:$0xff]   ;;  %v2948_v1 = vld [vmem:[%s3505_s30 + $0x70] sm:$0xff]   ;;  %v2952_v22 = vld [vmem:[%s3505_s30 + $0x68] sm:$0xff]   ;;  %p2990_p5 = scmp.lt.s32.totalorder %s2988_s15, %s2982_s22 }
 0x28e   : > { %2733 = vmatprep.subr.bf16.mxu1 %v2921_v36  ;;  %2038 = vmatprep.mubr.bf16.mxu1 %v2628_v60  ;;  %v2947_v0 = vld [vmem:[%s3505_s30 + $0xb8] sm:$0xff]   ;;  %v2949_v21 = vld [vmem:[%s3505_s30 + $0xf0] sm:$0xff]   ;;  %v2953_v4 = vld [vmem:[%s3505_s30 + $0xe8] sm:$0xff]  }
 0x28f   : > { %v2950_v2 = vld [vmem:[%s3505_s30 + $0x30] sm:$0xff]   ;;  %v2954_v5 = vld [vmem:[%s3505_s30 + $0x28] sm:$0xff]   ;;  %v2956_v7 = vld [vmem:[%s3505_s30 + $0x60] sm:$0xff]   ;;  %p2991_p7 = por %p2990_p5, %p2989_p4 }
 0x290   : > { %2712 = vmatpush3.bf16.msra.mxu0 %v2922_v37  ;;  %v2951_v3 = vld [vmem:[%s3505_s30 + $0xb0] sm:$0xff]   ;;  %v2955_v6 = vld [vmem:[%s3505_s30 + $0xa8] sm:$0xff]   ;;  %v2957_v10 = vld [vmem:[%s3505_s30 + $0xe0] sm:$0xff]  }
 0x291   : > { %2734 = vmatpush3.bf16.msra.mxu1 %v2923_v38  ;;  %2713 = vmatprep.subr.bf16.mxu0 %v2924_v39  ;;  %v2958_v8 = vld [vmem:[%s3505_s30 + $0x20] sm:$0xff]   ;;  %v2960_v9 = vld [vmem:[%s3505_s30 + $0x58] sm:$0xff]   ;;  %v2964_v17 = vld [vmem:[%s3505_s30 + $0x50] sm:$0xff]   ;;  %p2992_p9 = pnand %p2991_p7, %p2985_p3 }
 0x292   : > { %2735 = vmatprep.subr.bf16.mxu1 %v2925_v40  ;;  %v2959_v29 = vld [vmem:[%s3505_s30 + $0xa0] sm:$0xff]   ;;  %v2961_v12 = vld [vmem:[%s3505_s30 + $0xd8] sm:$0xff]   ;;  %v2965_v11 = vld [vmem:[%s3505_s30 + $0xd0] sm:$0xff]  }
 0x293   : > { %v2962_v15 = vld [vmem:[%s3505_s30 + $0x18] sm:$0xff]   ;;  %v2966_v18 = vld [vmem:[%s3505_s30 + $0x10] sm:$0xff]   ;;  %v2968_v19 = vld [vmem:[%s3505_s30 + $0x48] sm:$0xff]  }
 0x294   : > { %2714 = vmatpush3.bf16.msra.mxu0 %v2926_v41  ;;  %v2963_v16 = vld [vmem:[%s3505_s30 + $0x98] sm:$0xff]   ;;  %v2967_v30 = vld [vmem:[%s3505_s30 + $0x90] sm:$0xff]   ;;  %v2969_v20 = vld [vmem:[%s3505_s30 + $0xc8] sm:$0xff]  }
 0x295   : > { %2736 = vmatpush3.bf16.msra.mxu1 %v2927_v42  ;;  %2715 = vmatprep.subr.bf16.mxu0 %v2928_v43  ;;  %v2970_v13 = vld [vmem:[%s3505_s30 + $0x8] sm:$0xff]   ;;  %v2972_v23 = vld [vmem:[%s3505_s30 + $0x40] sm:$0xff]   ;;  %v2624_v31 = vld [vmem:[%s3860_s18] ss:$0 sm:$0xff] }
 0x296   : > { %2737 = vmatprep.subr.bf16.mxu1 %v2929_v44  ;;  %v2971_v14 = vld [vmem:[%s3505_s30 + $0x88] sm:$0xff]   ;;  %v2973_v24 = vld [vmem:[%s3505_s30 + $0xc0] sm:$0xff]  }
 0x297   : > { %v2974_v25 = vld [vmem:[%s3505_s30] sm:$0xff]  }
 0x298   : > { %2716 = vmatpush3.bf16.msra.mxu0 %v2930_v45  ;;  %v2975_v26 = vld [vmem:[%s3505_s30 + $0x80] sm:$0xff]   ;;  %s3845_s30 = sshll.u32 %s3175_s17, 7 }
 0x299   : > { %2738 = vmatpush3.bf16.msra.mxu1 %v2931_v46  ;;  %2717 = vmatprep.subr.bf16.mxu0 %v2932_v47  ;;  %s2423_s16 = scalar_lea.hbm %s3836_s13, %s3845_s30 }
 0x29a   : > { %2739 = vmatprep.subr.bf16.mxu1 %v2933_v48 }
 0x29c   : > { %2718 = vmatpush3.bf16.msra.mxu0 %v2934_v49 }
 0x29d   : > { %2740 = vmatpush3.bf16.msra.mxu1 %v2935_v50  ;;  %2719 = vmatprep.subr.bf16.mxu0 %v2936_v51 }
 0x29e   : > { %2741 = vmatprep.subr.bf16.mxu1 %v2937_v52 }
 0x2a0   : > { %2720 = vmatpush3.bf16.msra.mxu0 %v2938_v53 }
 0x2a1   : > { %2742 = vmatpush3.bf16.msra.mxu1 %v2939_v54  ;;  %2749 = vmatprep.subr.bf16.mxu0 %v2944_v61 }
 0x2a2   : > { %2771 = vmatprep.subr.bf16.mxu1 %v2945_v62 }
 0x2a3   : > { %1999 = vmatmul.mubr.bf16.vlgmr.msra.gmra.mxu0 %v3715_v57 }
 0x2a4   : > { %2039 = vmatmul.mubr.bf16.vlgmr.msra.gmra.mxu1 %v3717_v59  ;;  %2750 = vmatpush3.bf16.msra.mxu0 %v2946_v63 }
 0x2a5   : > { %2772 = vmatpush3.bf16.msra.mxu1 %v2947_v0  ;;  %2751 = vmatprep.subr.bf16.mxu0 %v2948_v1 }
 0x2a6   : > { %2346 = vmatprep.mubr.bf16.mxu0 %v2626_v58  ;;  %2773 = vmatprep.subr.bf16.mxu1 %v2949_v21 }
 0x2a7   : > { %2386 = vmatprep.mubr.bf16.mxu1 %v2628_v60 }
 0x2a8   : > { %2752 = vmatpush3.bf16.msra.mxu0 %v2950_v2 }
 0x2a9   : > { %2774 = vmatpush3.bf16.msra.mxu1 %v2951_v3  ;;  %2753 = vmatprep.subr.bf16.mxu0 %v2952_v22 }
 0x2aa   : > { %2775 = vmatprep.subr.bf16.mxu1 %v2953_v4 }
 0x2ac   : > { %2754 = vmatpush3.bf16.msra.mxu0 %v2954_v5 }
 0x2ad   : > { %2776 = vmatpush3.bf16.msra.mxu1 %v2955_v6  ;;  %2755 = vmatprep.subr.bf16.mxu0 %v2956_v7 }
 0x2ae   : > { %2777 = vmatprep.subr.bf16.mxu1 %v2957_v10 }
 0x2b0   : > { %2756 = vmatpush3.bf16.msra.mxu0 %v2958_v8 }
 0x2b1   : > { %2778 = vmatpush3.bf16.msra.mxu1 %v2959_v29  ;;  %2757 = vmatprep.subr.bf16.mxu0 %v2960_v9 }
 0x2b2   : > { %2779 = vmatprep.subr.bf16.mxu1 %v2961_v12 }
 0x2b4   : > { %2758 = vmatpush3.bf16.msra.mxu0 %v2962_v15 }
 0x2b5   : > { %2780 = vmatpush3.bf16.msra.mxu1 %v2963_v16  ;;  %2759 = vmatprep.subr.bf16.mxu0 %v2964_v17 }
 0x2b6   : > { %2781 = vmatprep.subr.bf16.mxu1 %v2965_v11 }
 0x2b8   : > { %2760 = vmatpush3.bf16.msra.mxu0 %v2966_v18 }
 0x2b9   : > { %2782 = vmatpush3.bf16.msra.mxu1 %v2967_v30  ;;  %2761 = vmatprep.subr.bf16.mxu0 %v2968_v19 }
 0x2ba   : > { %2783 = vmatprep.subr.bf16.mxu1 %v2969_v20 }
 0x2bc   : > { %2762 = vmatpush3.bf16.msra.mxu0 %v2970_v13 }
 0x2bd   : > { %2784 = vmatpush3.bf16.msra.mxu1 %v2971_v14  ;;  %2763 = vmatprep.subr.bf16.mxu0 %v2972_v23 }
 0x2be   : > { %2785 = vmatprep.subr.bf16.mxu1 %v2973_v24 }
 0x2c0   : > { %2764 = vmatpush3.bf16.msra.mxu0 %v2974_v25 }
 0x2c1   : > { %2786 = vmatpush3.bf16.msra.mxu1 %v2975_v26 }
 0x2c3   : > { %2347 = vmatmul.mubr.bf16.vlgmr.msra.gmra.mxu0 %v3715_v57 }
 0x2c4   : > { %2387 = vmatmul.mubr.bf16.vlgmr.msra.gmra.mxu1 %v3717_v59 }
 0x363   : > { %v2721_v27 = vpop.f32.mrf.mxu0 }
 0x364   : > { %v2743_v28 = vpop.f32.mrf.mxu1 }
 0x365   : > { %v2722_v32 = vpop.f32.mrf.mxu0 }
 0x366   : > { %v2744_v33 = vpop.f32.mrf.mxu1  ;;  %v2723_v34 = vadd.f32 %v2722_v32, %v2721_v27 }
 0x367   : > { %v2745_v35 = vadd.f32 %v2744_v33, %v2743_v28  ;;  %v2724_v36 = vpop.f32.mrf.mxu0 }
 0x368   : > { %v2746_v37 = vpop.f32.mrf.mxu1  ;;  %v2001_v38 = vadd.f32 %v2723_v34, %v2624_v31 }
 0x369   : > { %v2725_v39 = vpop.f32.mrf.mxu0 }
 0x36a   : > { %v2747_v40 = vpop.f32.mrf.mxu1  ;;  %v2041_v41 = vadd.f32 %v2745_v35, %v2001_v38 }
 0x36c   : > { %v2046_v42 = vmul.f32 1.442695, %v2041_v41 }
 0x36e   : > { %2976 = vpow2.f32 %v2046_v42 }
 0x37b   : > { %v2977_v43 = vpop.eup %2976 }
 0x37c   : > { %v2048_v44 = vmax.f32 %v2977_v43, 1e-05 }
 0x37e   : > { %v2049_v45 = vmin.f32 %v2048_v44, 1000000.0 }
 0x380   : > { %2050 = vst [vmem:[%s3507_s19] sm:$0xff] %v2049_v45 }
 0x381   : > { %2995 = shalt.err (!%p2992_p9)
}
 0x382   : > { %s2996_s11 = scalar_lea.hbm %s2423_s16, 128  ;;  %s3000_s21 = scalar_lea.hbm %s3836_s13, 384 }
 0x383   : > { %p2997_p10 = scmp.ne.s32.totalorder %s2423_s16, %s2996_s11  ;;  %p3001_p13 = scmp.lt.s32.totalorder %s2423_s16, %s3836_s13 }
 0x384   : > { %p3002_p0 = scmp.lt.s32.totalorder %s3000_s21, %s2996_s11 }
 0x385   : > { %p2998_p11 = pnand %p2997_p10, %p3197_p6 }
 0x386   : > { %p3003_p1 = por %p3002_p0, %p3001_p13 }
 0x387   : > { %p2999_p12 = pneg %p2998_p11 }
 0x389   : > { %p3004_p2 = pnand %p3003_p1, %p2999_p12 }
 0x38b   : > { %3007 = shalt.err (!%p3004_p2)
}
 0x38c   : > { %2801 = dma.vmem_to_hbm [thread:$0]  (%p3197_p6), %s2426_s20, 128, %s2423_s16, %s2407_s9   ;;  %v2765_v46 = vpop.f32.mrf.mxu0  ;;  %v2787_v47 = vpop.f32.mrf.mxu1 }
 0x38d   : > { %s3861_s28 = scalar_lea.vmem %s3835_s12, %s3493_s26  ;;  %s2438_s26 = sshll.u32 %s3509_s25, 4  ;;  %s2439_s26 = int_to_ptr.vmem [resolvable:$true] %s2438_s26 }
 0x38e   : > { %v2661_v48 = vld [vmem:[%s3861_s28] ss:$0 sm:$0xff]  ;;  %v2766_v49 = vpop.f32.mrf.mxu0  ;;  %v2788_v50 = vpop.f32.mrf.mxu1  ;;  %s3862_s30 = sshll.u32 %s3175_s17, 7  ;;  %s2412_s15 = scalar_lea.sflag [#allocation8], %s3487_s23 }
 0x38f   : > { %v2767_v51 = vadd.f32 %v2766_v49, %v2765_v46  ;;  %v2789_v55 = vadd.f32 %v2788_v50, %v2787_v47  ;;  %s2436_s9 = scalar_lea.hbm %s3837_s14, %s3862_s30  ;;  %s3008_s11 = scalar_lea.vmem %s2439_s26, 128 }
 0x390   : > { %v2768_v52 = vpop.f32.mrf.mxu0  ;;  %v2790_v53 = vpop.f32.mrf.mxu1  ;;  %p3009_p3 = scmp.ne.s32.totalorder %s2439_s26, %s3008_s11  ;;  %s3078_s19 = smov [#allocation7]  }
 0x391   : > { %v2349_v54 = vadd.f32 %v2767_v51, %v2661_v48  ;;  %s3012_s18 = sshll.u32 %s3078_s19, 4  ;;  %s3013_s18 = int_to_ptr.vmem [resolvable:$false] %s3012_s18 }
 0x392   : > { %v2769_v56 = vpop.f32.mrf.mxu0  ;;  %v2791_v57 = vpop.f32.mrf.mxu1  ;;  %p3010_p4 = pnand %p3009_p3, %p3197_p6  ;;  %s3014_s21 = scalar_lea.vmem %s3013_s18, 256 }
 0x393   : > { %v2389_v58 = vadd.f32 %v2789_v55, %v2349_v54  ;;  %p3015_p7 = scmp.lt.s32.totalorder %s2439_s26, %s3013_s18  ;;  %p3016_p9 = scmp.lt.s32.totalorder %s3014_s21, %s3008_s11 }
 0x394   : > { %p3011_p5 = pneg %p3010_p4 }
 0x395   : > { %v2395_v59 = vand.u32 2147483647, %v2389_v58  ;;  %v2394_v1 = vmax.f32 %v2389_v58, 0.0  ;;  %p3017_p10 = por %p3016_p9, %p3015_p7 }
 0x397   : > { %v2396_v60 = vsub.f32 0.0, %v2395_v59  ;;  %p3018_p11 = pnand %p3017_p10, %p3011_p5 }
 0x399   : > { %v2397_v61 = vmul.f32 1.442695, %v2396_v60 }
 0x39b   : > { %2978 = vpow2.f32 %v2397_v61 }
 0x3a8   : > { %v2979_v62 = vpop.eup %2978 }
 0x3a9   : > { %v2399_v63 = vadd.f32 1.0, %v2979_v62 }
 0x3ab   : > { %2980 = vlog2.f32 %v2399_v63 }
 0x3b8   : > { %v2981_v0 = vpop.eup %2980 }
 0x3b9   : > { %v2401_v21 = vmul.f32 0.6931472, %v2981_v0 }
 0x3bb   : > { %v2402_v2 = vadd.f32 %v2401_v21, %v2394_v1 }
 0x3bd   : > { %v2403_v3 = vmax.f32 %v2402_v2, 0.0001 }
 0x3bf   : > { %v2404_v22 = vmin.f32 %v2403_v3, 10000.0 }
 0x3c1   : > { %2405 = vst [vmem:[%s3509_s25] sm:$0xff] %v2404_v22 }
 0x3c2   : > { %3021 = shalt.err (!%p3018_p11)
}
 0x3c3   : > { %s3022_s17 = scalar_lea.hbm %s2436_s9, 128  ;;  %s3026_s29 = scalar_lea.hbm %s3837_s14, 384 }
 0x3c4   : > { %p3023_p12 = scmp.ne.s32.totalorder %s2436_s9, %s3022_s17  ;;  %p3027_p1 = scmp.lt.s32.totalorder %s2436_s9, %s3837_s14 }
 0x3c5   : > { %p3028_p2 = scmp.lt.s32.totalorder %s3026_s29, %s3022_s17 }
 0x3c6   : > { %p3024_p13 = pnand %p3023_p12, %p3197_p6 }
 0x3c7   : > { %p3029_p3 = por %p3028_p2, %p3027_p1 }
 0x3c8   : > { %p3025_p0 = pneg %p3024_p13 }
 0x3ca   : > { %p3030_p4 = pnand %p3029_p3, %p3025_p0 }
 0x3cc   : > { %3033 = shalt.err (!%p3030_p4)
}
 0x3cd   : > { %2802 = dma.vmem_to_hbm [thread:$0]  (%p3197_p6), %s2439_s26, 128, %s2436_s9, %s2412_s15  }
 0x3ce PF: > { %s3863_s28 = sld [smem:[#allocation14_spill]] }
 0x3cf   : > { %s3864_s30 = sld [smem:[#allocation11_spill]] }
 0x3d4   : > { %p2812_p5 = scmp.ge.s32.totalorder %s3863_s28, 2 }
 0x3d5   : > { %s2450_s16 = sand.u32 1, %s3864_s30  }
 0x3d6   : > { %p2806_p7 = pnand %p2812_p5, %p3201_p8  ;;  %s2451_s11 = scalar_lea.sflag [#allocation6], %s2450_s16 }
 0x3d8   : > { %p2807_p9 = pneg %p2806_p7 }
 0x3da   : > { %3051 = dma.done.wait (%p2807_p9), %s2451_s11, 128  }
 0x3db   : > { %3053 = vsyncadd (%p2807_p9), %s2451_s11, 4294967168  ;;  %s2460_s19 = scalar_lea.sflag [#allocation8], %s2450_s16 }
 0x3dc   : > { %3055 = dma.done.wait (%p2807_p9), %s2460_s19, 128  }
 0x3dd   : > { %3057 = vsyncadd (%p2807_p9), %s2460_s19, 4294967168  ;;  %s3866_s16 = sld [smem:[#allocation15_spill]] }
 0x3de   : > { %s3867_s29 = sld [smem:[#allocation12_spill]] }
 0x3df   : > { %s3868_s30 = sld [smem:[#allocation13_spill]] }
 0x3e0   : > { %s3869_s15 = sld [smem:[#allocation16_spill]] }
 0x3e3   : > { %p28_p6 = scmp.ge.s32.totalorder %s3866_s16, 5  }
 0x3e5   :  { %30 = sbr.rel (!%p28_p6) target bundleno = 8 (0x8), region = 229 }
 0x3ea   :  { %2465 = vsyncpa [#allocation6], 1 }
 0x3eb   :  { %2467 = vsyncpa [#allocation6 + $0x1], 1 }
 0x3ec   :  { %2468 = vsyncpa [#allocation8], 1 }
 0x3ed   :  { %2470 = vsyncpa [#allocation8 + $0x1], 1 }

</bundles_post_ra>
